<compile_context>
chip_gen: v7x
topology: tpu7x:2x2x1
jax: 0.10.0
libtpu: 0.0.40
codegen_flags: <defaults>
</compile_context>

<pallas_src>
import jax
import jax.numpy as jnp
from jax import lax
from jax.experimental import pallas as pl
from jax.experimental.pallas import tpu as pltpu

BN_EPS = 1e-5


# ----------------------------------------------------------------------------
# Pallas kernels
# ----------------------------------------------------------------------------
def _conv_bn_relu_kernel(p_ref, w_ref, b_ref, o_ref):
    # p_ref: (tm, K) bf16 im2col patches
    # w_ref: (K, Cout) bf16 conv weight with the BN scale already folded in
    # b_ref: (1, Cout) f32 folded BN bias
    acc = jnp.dot(p_ref[...], w_ref[...], preferred_element_type=jnp.float32)
    o_ref[...] = jnp.maximum(acc + b_ref[...], 0.0).astype(o_ref.dtype)


def _maxpool_kernel(yp_ref, o_ref):
    # yp_ref block: (1, 2*PH+1, 2*PW+1, C) feature map, -inf padded on top/left.
    # o_ref  block: (1, PH, PW, C)
    # 3x3 stride-2 max decomposed as: adjacent (stride-1) max followed by a
    # pair reduce (which is the stride-2 selection), per direction.
    yp = yp_ref[0]                                       # (2PH+1, 2PW+1, C)
    Hp, Wp, C = yp.shape
    PH, PW = (Hp - 1) // 2, (Wp - 1) // 2
    # H direction (cheap: leading-axis slices / leading-axis pair reduce).
    mh = jnp.maximum(yp[:-1], yp[1:])                    # (2PH, Wp, C)
    h2 = jnp.max(mh.reshape(PH, 2, Wp, C), axis=1)       # (PH, Wp, C)
    # W direction on the already-halved array.
    mw = jnp.maximum(h2[:, :-1, :], h2[:, 1:, :])        # (PH, 2PW, C)
    o_ref[0] = jnp.max(mw.reshape(PH, PW, 2, C), axis=2)  # (PH, PW, C)


# ----------------------------------------------------------------------------
# Pallas call wrappers
# ----------------------------------------------------------------------------
def _pick_tm(M, cap=1024):
    # Row tile for the conv matmul: as large as sensible, but keep >= 2 grid
    # steps when M allows so both v7x TensorCores get work (megacore sharding).
    tm = min(cap, M)
    if M > 8 and pl.cdiv(M, tm) < 2:
        tm = max(8, (((M + 1) // 2) + 7) // 8 * 8)
    return tm


def conv_bn_relu(patches, wmat, bias, *, tm):
    Mp, K = patches.shape
    Cout = wmat.shape[1]
    assert Mp % tm == 0  # guaranteed: caller pads M up to a multiple of tm
    return pl.pallas_call(
        _conv_bn_relu_kernel,
        out_shape=jax.ShapeDtypeStruct((Mp, Cout), jnp.float32),
        grid=(Mp // tm,),
        in_specs=[
            pl.BlockSpec((tm, K), lambda i: (i, 0)),       # K = 147, unpadded (full dim)
            pl.BlockSpec((K, Cout), lambda i: (0, 0)),
            pl.BlockSpec((1, Cout), lambda i: (0, 0)),
        ],
        out_specs=pl.BlockSpec((tm, Cout), lambda i: (i, 0)),
        compiler_params=pltpu.CompilerParams(dimension_semantics=("parallel",)),
    )(patches, wmat, bias)


def maxpool_3x3_s2(y_nhwc):
    # 3x3 / stride-2 / pad-1 max pool, computed in-kernel (no 9-slab HBM blowup).
    N, OH, OW, C = y_nhwc.shape
    assert OH % 2 == 0 and OW % 2 == 0, "resnet stem feature map assumed even-sized"
    PH, PW = OH // 2, OW // 2
    # With even OH/OW only the top/left border of the 3x3 window can fall
    # outside the map, so a 1-wide -inf pad on those two sides is sufficient.
    yp = jnp.pad(y_nhwc, ((0, 0), (1, 0), (1, 0), (0, 0)),
                 constant_values=-jnp.inf)                 # (N, OH+1, OW+1, C)
    return pl.pallas_call(
        _maxpool_kernel,
        out_shape=jax.ShapeDtypeStruct((N, PH, PW, C), jnp.float32),
        grid=(N,),
        in_specs=[pl.BlockSpec((1, OH + 1, OW + 1, C), lambda n: (n, 0, 0, 0))],
        out_specs=pl.BlockSpec((1, PH, PW, C), lambda n: (n, 0, 0, 0)),
        compiler_params=pltpu.CompilerParams(dimension_semantics=("parallel",)),
    )(yp)


# ----------------------------------------------------------------------------
# JAX glue: im2col patch extraction (gathers + reshapes only)
# ----------------------------------------------------------------------------
def _im2col(x_nhwc, kh, kw, stride, pad):
    N, H, W, C = x_nhwc.shape
    OH = (H + 2 * pad - kh) // stride + 1
    OW = (W + 2 * pad - kw) // stride + 1
    xp = jnp.pad(x_nhwc, ((0, 0), (pad, pad), (pad, pad), (0, 0)))
    cols = []
    for ih in range(kh):
        for iw in range(kw):
            cols.append(
                xp[:, ih:ih + stride * OH:stride, iw:iw + stride * OW:stride, :]
            )
    p = jnp.stack(cols, axis=3)                     # (N, OH, OW, kh*kw, C)
    return p.reshape(N * OH * OW, kh * kw * C), (N, OH, OW)


# ----------------------------------------------------------------------------
# model_extractor forward (resnet18, num_layers=4)
# ----------------------------------------------------------------------------
@jax.jit
def model_extractor_forward(x_nchw, params):
    # TODO(synk): PyTorch model_extractor with fix_weights=True calls .train(),
    # which makes BatchNorm use batch statistics; here BN uses running statistics
    # (eval-style), folded into the conv weight (scale) and a bias add.
    x = jnp.transpose(x_nchw, (0, 2, 3, 1)).astype(jnp.float32)   # NCHW -> NHWC

    # --- conv1 + bn1 + relu as one fused Pallas MXU matmul (bf16 in, f32 acc) ---
    # TODO(synk): the im2col patch matrix is still materialized by XLA in HBM;
    # moving patch extraction into the kernel (pl.ANY input + in-kernel gathers)
    # would remove that remaining HBM traffic.
    patches, (N, OH, OW) = _im2col(x.astype(jnp.bfloat16), 7, 7, stride=2, pad=3)
    K = patches.shape[1]                                          # 147 (no K padding)

    scale = params["gamma"] / jnp.sqrt(params["running_var"] + BN_EPS)
    bias = (params["beta"] - params["running_mean"] * scale)[None, :]     # (1, 64) f32
    wmat = jnp.transpose(params["conv_w"], (2, 3, 1, 0)).reshape(K, -1)   # (147, 64)
    wmat = (wmat * scale).astype(jnp.bfloat16)        # BN scale folded into the weight

    M = patches.shape[0]
    tm = _pick_tm(M)
    Mp = pl.cdiv(M, tm) * tm
    if Mp != M:                                       # pad M instead of asserting
        patches = jnp.pad(patches, ((0, Mp - M), (0, 0)))

    y = conv_bn_relu(patches, wmat, bias, tm=tm)      # (Mp, 64) f32
    y = y[:M].reshape(N, OH, OW, -1)                  # NHWC feature map

    # --- maxpool 3x3 / stride 2 / pad 1 (in-kernel Pallas pool) ---
    z = maxpool_3x3_s2(y)                             # (N, PH, PW, 64)
    return jnp.transpose(z, (0, 3, 1, 2))             # back to NCHW


# ----------------------------------------------------------------------------
# Pure-JAX reference (for correctness check)
# ----------------------------------------------------------------------------
def reference_forward(x_nchw, params):
    y = lax.conv_general_dilated(
        x_nchw.astype(jnp.float32), params["conv_w"],
        window_strides=(2, 2), padding=((3, 3), (3, 3)),
        dimension_numbers=("NCHW", "OIHW", "NCHW"),
        precision=lax.Precision.HIGHEST,
    )
    scale = params["gamma"] / jnp.sqrt(params["running_var"] + BN_EPS)
    bias = params["beta"] - params["running_mean"] * scale
    y = jnp.maximum(y * scale[None, :, None, None] + bias[None, :, None, None], 0.0)
    z = lax.reduce_window(
        y, -jnp.inf, lax.max,
        window_dimensions=(1, 1, 3, 3), window_strides=(1, 1, 2, 2),
        padding=((0, 0), (0, 0), (1, 1), (1, 1)),
    )
    return z


# ----------------------------------------------------------------------------
if __name__ == "__main__":
    key = jax.random.PRNGKey(0)
    k_w, k_g, k_b, k_m, k_v, k_x = jax.random.split(key, 6)

    params = {
        "conv_w": 0.05 * jax.random.normal(k_w, (64, 3, 7, 7), jnp.float32),
        "gamma": 1.0 + 0.1 * jax.random.normal(k_g, (64,), jnp.float32),
        "beta": 0.1 * jax.random.normal(k_b, (64,), jnp.float32),
        "running_mean": 0.1 * jax.random.normal(k_m, (64,), jnp.float32),
        "running_var": 1.0 + 0.1 * jnp.abs(jax.random.normal(k_v, (64,), jnp.float32)),
    }

    # small input consistent with the resnet18 stem: NCHW, 3 channels
    x = jax.random.normal(k_x, (2, 3, 32, 32), jnp.float32)

    out = jax.block_until_ready(model_extractor_forward(x, params))
    assert out.shape == (2, 64, 8, 8), out.shape

    ref = jax.block_until_ready(reference_forward(x, params))
    # bf16 matmul inputs vs. f32-HIGHEST reference -> loosened tolerance
    assert jnp.allclose(out, ref, atol=2e-2, rtol=2e-2), (
        float(jnp.max(jnp.abs(out - ref)))
    )

    print("KERNEL_OK")
</pallas_src>

<mosaic_0001>
module attributes {stable_mosaic.version = 11 : i64} {
  func.func @_conv_bn_relu_kernel(%arg0: i32, %arg1: memref<256x147xbf16, #tpu.memory_space<vmem>>, %arg2: memref<147x64xbf16, #tpu.memory_space<vmem>>, %arg3: memref<1x64xf32, #tpu.memory_space<vmem>>, %arg4: memref<256x64xf32, #tpu.memory_space<vmem>>) attributes {dimension_semantics = [#tpu.dimension_semantics<parallel>], iteration_bounds = array<i64: 2>, scalar_prefetch = 0 : i64, scratch_operands = 0 : i64, tpu.core_type = #tpu.core_type<tc>, window_params = [{transform_indices = @transform_0, window_bounds = array<i64: 256, 147>}, {pipeline_mode = #tpu.pipeline_mode<synchronous>, transform_indices = @transform_1, window_bounds = array<i64: 147, 64>}, {pipeline_mode = #tpu.pipeline_mode<synchronous>, transform_indices = @transform_2, window_bounds = array<i64: 1, 64>}, {transform_indices = @transform_3, window_bounds = array<i64: 256, 64>}]} {
    %c0 = arith.constant 0 : index
    %c0_0 = arith.constant 0 : index
    %0 = vector.load %arg1[%c0, %c0_0] : memref<256x147xbf16, #tpu.memory_space<vmem>>, vector<256x147xbf16>
    %c0_1 = arith.constant 0 : index
    %c0_2 = arith.constant 0 : index
    %1 = vector.load %arg2[%c0_1, %c0_2] : memref<147x64xbf16, #tpu.memory_space<vmem>>, vector<147x64xbf16>
    %cst = arith.constant dense<0.000000e+00> : vector<256x64xf32>
    %2 = tpu.matmul %0, %1, %cst {dimension_numbers = #tpu.dot_dimension_numbers<[1], [0], [0], [1], [0, 0, 1, 1], [], []>} : vector<256x147xbf16>, vector<147x64xbf16>, vector<256x64xf32> -> vector<256x64xf32>
    %c0_3 = arith.constant 0 : index
    %c0_4 = arith.constant 0 : index
    %3 = vector.load %arg3[%c0_3, %c0_4] : memref<1x64xf32, #tpu.memory_space<vmem>>, vector<1x64xf32>
    %4 = vector.broadcast %3 : vector<1x64xf32> to vector<256x64xf32>
    %5 = arith.addf %2, %4 : vector<256x64xf32>
    %cst_5 = arith.constant 0.000000e+00 : f32
    %6 = vector.broadcast %cst_5 : f32 to vector<256x64xf32>
    %7 = arith.maximumf %5, %6 : vector<256x64xf32>
    %c0_6 = arith.constant 0 : index
    %c0_7 = arith.constant 0 : index
    %8 = vector.load %arg4[%c0_6, %c0_7] : memref<256x64xf32, #tpu.memory_space<vmem>>, vector<256x64xf32>
    tpu.vector_store %arg4[%c0_6, %c0_7], %7 {strides = array<i32>} : memref<256x64xf32, #tpu.memory_space<vmem>>, vector<256x64xf32>,
    return
  }
  func.func @transform_0(%arg0: i32) -> (i32, i32) {
    %c0_i32 = arith.constant 0 : i32
    %c0_i32_0 = arith.constant 0 : i32
    return %arg0, %c0_i32 : i32, i32
  }
  func.func @transform_1(%arg0: i32) -> (i32, i32) {
    %c0_i32 = arith.constant 0 : i32
    %c0_i32_0 = arith.constant 0 : i32
    %c0_i32_1 = arith.constant 0 : i32
    return %c0_i32, %c0_i32_0 : i32, i32
  }
  func.func @transform_2(%arg0: i32) -> (i32, i32) {
    %c0_i32 = arith.constant 0 : i32
    %c0_i32_0 = arith.constant 0 : i32
    %c0_i32_1 = arith.constant 0 : i32
    return %c0_i32, %c0_i32_0 : i32, i32
  }
  func.func @transform_3(%arg0: i32) -> (i32, i32) {
    %c0_i32 = arith.constant 0 : i32
    %c0_i32_0 = arith.constant 0 : i32
    return %arg0, %c0_i32 : i32, i32
  }
}

module attributes {stable_mosaic.version = 11 : i64} {
  func.func @_maxpool_kernel(%arg0: i32, %arg1: memref<1x17x17x64xf32, #tpu.memory_space<vmem>>, %arg2: memref<1x8x8x64xf32, #tpu.memory_space<vmem>>) attributes {dimension_semantics = [#tpu.dimension_semantics<parallel>], iteration_bounds = array<i64: 2>, scalar_prefetch = 0 : i64, scratch_operands = 0 : i64, tpu.core_type = #tpu.core_type<tc>, window_params = [{transform_indices = @transform_0, window_bounds = array<i64: 1, 17, 17, 64>}, {transform_indices = @transform_1, window_bounds = array<i64: 1, 8, 8, 64>}]} {
    %c0 = arith.constant 0 : index
    %c0_0 = arith.constant 0 : index
    %c0_1 = arith.constant 0 : index
    %c0_2 = arith.constant 0 : index
    %0 = vector.load %arg1[%c0, %c0_0, %c0_1, %c0_2] : memref<1x17x17x64xf32, #tpu.memory_space<vmem>>, vector<1x17x17x64xf32>
    %1 = vector.shape_cast %0 : vector<1x17x17x64xf32> to vector<17x17x64xf32>
    %2 = vector.extract_strided_slice %1 {offsets = [0, 0, 0], sizes = [16, 17, 64], strides = [1, 1, 1]} : vector<17x17x64xf32> to vector<16x17x64xf32>
    %3 = vector.extract_strided_slice %1 {offsets = [1, 0, 0], sizes = [16, 17, 64], strides = [1, 1, 1]} : vector<17x17x64xf32> to vector<16x17x64xf32>
    %4 = arith.maximumf %2, %3 : vector<16x17x64xf32>
    %5 = vector.shape_cast %4 : vector<16x17x64xf32> to vector<8x2x17x64xf32>
    %cst = arith.constant dense<0xFF800000> : vector<8x17x64xf32>
    %6 = vector.multi_reduction <maximumf>, %5, %cst [1] : vector<8x2x17x64xf32> to vector<8x17x64xf32>
    %7 = vector.extract_strided_slice %6 {offsets = [0, 0, 0], sizes = [8, 16, 64], strides = [1, 1, 1]} : vector<8x17x64xf32> to vector<8x16x64xf32>
    %8 = vector.extract_strided_slice %6 {offsets = [0, 1, 0], sizes = [8, 16, 64], strides = [1, 1, 1]} : vector<8x17x64xf32> to vector<8x16x64xf32>
    %9 = arith.maximumf %7, %8 : vector<8x16x64xf32>
    %10 = vector.shape_cast %9 : vector<8x16x64xf32> to vector<8x8x2x64xf32>
    %cst_3 = arith.constant dense<0xFF800000> : vector<8x8x64xf32>
    %11 = vector.multi_reduction <maximumf>, %10, %cst_3 [2] : vector<8x8x2x64xf32> to vector<8x8x64xf32>
    %c0_4 = arith.constant 0 : index
    %c0_5 = arith.constant 0 : index
    %c0_6 = arith.constant 0 : index
    %c0_7 = arith.constant 0 : index
    %12 = vector.load %arg2[%c0_4, %c0_5, %c0_6, %c0_7] : memref<1x8x8x64xf32, #tpu.memory_space<vmem>>, vector<1x8x8x64xf32>
    %13 = vector.shape_cast %12 : vector<1x8x8x64xf32> to vector<8x8x64xf32>
    %14 = vector.shape_cast %11 : vector<8x8x64xf32> to vector<1x8x8x64xf32>
    tpu.vector_store %arg2[%c0_4, %c0_5, %c0_6, %c0_7], %14 {strides = array<i32>} : memref<1x8x8x64xf32, #tpu.memory_space<vmem>>, vector<1x8x8x64xf32>,
    return
  }
  func.func @transform_0(%arg0: i32) -> (i32, i32, i32, i32) {
    %c0_i32 = arith.constant 0 : i32
    %c0_i32_0 = arith.constant 0 : i32
    %c0_i32_1 = arith.constant 0 : i32
    %c0_i32_2 = arith.constant 0 : i32
    return %arg0, %c0_i32, %c0_i32_0, %c0_i32_1 : i32, i32, i32, i32
  }
  func.func @transform_1(%arg0: i32) -> (i32, i32, i32, i32) {
    %c0_i32 = arith.constant 0 : i32
    %c0_i32_0 = arith.constant 0 : i32
    %c0_i32_1 = arith.constant 0 : i32
    %c0_i32_2 = arith.constant 0 : i32
    return %arg0, %c0_i32, %c0_i32_0, %c0_i32_1 : i32, i32, i32, i32
  }
}

</mosaic_0001>

<bundles_post_ra>
// kernel: model_extractor_forward.2
= control target key start
LH: loop header
LB: loop body
LE: loop exit
PB: predicated region body
PF: predicated region fallthrough
CT: control target
= control target key end

     0   :  { %s965_s12 = smov 0   ;;  %s1172_s0 = inlined_call_operand.vmem [shape: bf16[512,147], index: 0, kind: input, shape index: {}]   ;;  %s1173_s1 = inlined_call_operand.vmem [shape: bf16[147,64], index: 1, kind: input, shape index: {}]   ;;  %s1174_s2 = inlined_call_operand.vmem [shape: f32[1,64], index: 2, kind: input, shape index: {}]   ;;  %s1175_s3 = inlined_call_operand.vmem [shape: f32[512,64], index: 3, kind: output, shape index: {}]  }
   0x1 LB: > { %s775_s13 = sadd.s32 4294967295, %s941_s12   ;;  %p779_p0 = scmp.ge.s32.totalorder %s941_s12, 1  ;;  %s941_s12 = sphi %s965_s12, %s13_s12  }
   0x2   : > { %p139_p1 = scmp.lt.s32.totalorder %s941_s12, 3 }
   0x4   : > { %p140_p2 = pnand %p779_p0, %p139_p1 }
   0x5   : > { %v877_v0 = vld [vmem:[%s1173_s1] sm:$0xff] (!%p140_p2)   ;;  %v943_v1 = vmov (!%p140_p2), 0   ;;  %v878_v2 = vld [vmem:[%s1173_s1 + $0x8] sm:$0xff] (!%p140_p2)   ;;  %v879_v3 = vld [vmem:[%s1173_s1 + $0x10] sm:$0xff] (!%p140_p2)   ;;  %s780_s20 = sshll.u32 (!%p140_p2), %s775_s13, 5  ;;  %vm437_vm0 = vcmask (!%p140_p2), 154624  }
   0x6   : > { %143 = sbr.rel (%p140_p2) target bundleno = 321 (0x141), region = 32  ;;  %493 = vmatprep.subr.bf16.mxu0 (!%p140_p2), %v943_v1  ;;  %847 = vmatprep.subr.bf16.mxu1 (!%p140_p2), %v943_v1  ;;  %p165_p3 = scmp.lt.s32.totalorder (!%p140_p2), %s780_s20, 63  ;;  %v880_v4 = vld [vmem:[%s1173_s1 + $0x18] sm:$0xff] (!%p140_p2)   ;;  %v881_v5 = vld [vmem:[%s1173_s1 + $0x20] sm:$0xff] (!%p140_p2)   ;;  %v882_v8 = vld [vmem:[%s1173_s1 + $0x28] sm:$0xff] (!%p140_p2)   ;;  %vm486_vm1 = vcmask (!%p140_p2), 1040384  }
   0x7   : > { %494 = vmatpush1.bf16.msra.mxu0 (!%p140_p2), %v877_v0  ;;  %857 = vmatpush1.bf16.msra.mxu1 (!%p140_p2), %v877_v0  ;;  %v883_v9 = vld [vmem:[%s1173_s1 + $0x30] sm:$0xff] (!%p140_p2)   ;;  %v884_v10 = vld [vmem:[%s1173_s1 + $0x38] sm:$0xff] (!%p140_p2)   ;;  %vm487_vm2 = vcmask (!%p140_p2), 1041408   ;;  %v944_v11 = vmov (!%p140_p2), 65535   ;;  %v885_v13 = vld [vmem:[%s1173_s1 + $0x40] sm:$0xff] (!%p140_p2)   ;;  %vm686_vm3 = vcmask (!%p140_p2), 523264  }
   0x8   : > { %495 = vmatprep.subr.bf16.mxu0 (!%p140_p2), %v943_v1  ;;  %848 = vmatprep.subr.bf16.mxu1 (!%p140_p2), %v943_v1  ;;  %v488_v12 = vsel (!%p140_p2), %vm486_vm1, 4294967295, %v944_v11  ;;  %v886_v14 = vld [vmem:[%s1173_s1 + $0x48] ss:$0 sps:$4 sm:$0x33] (!%p140_p2)   ;;  %v1064_v47 = vld [vmem:[%s1174_s2] ss:$0 sm:$0xff] (!%p140_p2) }
   0x9   : > { %v489_v15 = vsel (!%p140_p2), %vm487_vm2, %v488_v12, 0 }
   0xa   : > { %v491_v16 = vand.u32 (!%p140_p2), %v886_v14, %v489_v15 }
   0xb   : > { %496 = vmatpush1.bf16.msra.mxu0 (!%p140_p2), %v878_v2  ;;  %858 = vmatpush1.bf16.msra.mxu1 (!%p140_p2), %v878_v2 }
   0xc   : > { %497 = vmatprep.subr.bf16.mxu0 (!%p140_p2), %v943_v1  ;;  %849 = vmatprep.subr.bf16.mxu1 (!%p140_p2), %v943_v1 }
   0xd   : > { %s1177_s20 = smov (!%p165_p3, %s780_s20), 63 }
   0xe   : > { %s846_s23 = sshll.u32 %s1177_s20, 3 }
   0xf   : > { %498 = vmatpush1.bf16.msra.mxu0 %v879_v3  ;;  %859 = vmatpush1.bf16.msra.mxu1 %v879_v3  ;;  %s993_s26 = scalar_lea.vmem %s1172_s0, %s846_s23  ;;  %s1073_s17 = scalar_lea.vmem %s1175_s3, %s846_s23 }
  0x10   : > { %499 = vmatprep.subr.bf16.mxu0 %v943_v1  ;;  %850 = vmatprep.subr.bf16.mxu1 %v943_v1  ;;  %v889_v6 = vld [vmem:[%s993_s26 + $0x4] ss:$8 sps:$4 sm:$0xff]   ;;  %v887_v17 = vld [vmem:[%s993_s26] ss:$8 sps:$4 sm:$0xff]   ;;  %v893_v19 = vld [vmem:[%s993_s26 + $0x14] ss:$8 sps:$4 sm:$0xff]  }
  0x11   : > { %v892_v7 = vld [vmem:[%s993_s26 + $0x84] ss:$8 sps:$4 sm:$0xff]   ;;  %828 = vmatprep.mubr.msk.bf16.mxu0 %vm437_vm0, %v889_v6  ;;  %v890_v18 = vld [vmem:[%s993_s26 + $0x80] ss:$8 sps:$4 sm:$0xff]   ;;  %v895_v20 = vld [vmem:[%s993_s26 + $0x94] ss:$8 sps:$4 sm:$0xff]  }
  0x12   : > { %836 = vmatprep.mubr.msk.bf16.mxu1 %vm437_vm0, %v892_v7  ;;  %v897_v21 = vld [vmem:[%s993_s26 + $0x10] ss:$8 sps:$4 sm:$0xff]   ;;  %v899_v23 = vld [vmem:[%s993_s26 + $0x24] ss:$8 sps:$4 sm:$0xff]   ;;  %v903_v25 = vld [vmem:[%s993_s26 + $0x20] ss:$8 sps:$4 sm:$0xff]  }
  0x13   : > { %500 = vmatpush1.bf16.msra.mxu0 %v880_v4  ;;  %860 = vmatpush1.bf16.msra.mxu1 %v880_v4  ;;  %v898_v22 = vld [vmem:[%s993_s26 + $0x90] ss:$8 sps:$4 sm:$0xff]   ;;  %v901_v24 = vld [vmem:[%s993_s26 + $0xa4] ss:$8 sps:$4 sm:$0xff]   ;;  %v904_v26 = vld [vmem:[%s993_s26 + $0xa0] ss:$8 sps:$4 sm:$0xff]  }
  0x14   : > { %501 = vmatprep.subr.bf16.mxu0 %v943_v1  ;;  %851 = vmatprep.subr.bf16.mxu1 %v943_v1  ;;  %v905_v27 = vld [vmem:[%s993_s26 + $0x34] ss:$8 sps:$4 sm:$0xff]   ;;  %v909_v29 = vld [vmem:[%s993_s26 + $0x30] ss:$8 sps:$4 sm:$0xff]   ;;  %v911_v31 = vld [vmem:[%s993_s26 + $0x44] ss:$8 sps:$4 sm:$0xff]  }
  0x15   : > { %v907_v28 = vld [vmem:[%s993_s26 + $0xb4] ss:$8 sps:$4 sm:$0xff]   ;;  %v910_v30 = vld [vmem:[%s993_s26 + $0xb0] ss:$8 sps:$4 sm:$0xff]   ;;  %v913_v32 = vld [vmem:[%s993_s26 + $0xc4] ss:$8 sps:$4 sm:$0xff]  }
  0x16   : > { %v915_v33 = vld [vmem:[%s993_s26 + $0x40] ss:$8 sps:$4 sm:$0xff]   ;;  %v917_v35 = vld [vmem:[%s993_s26 + $0x54] ss:$8 sps:$4 sm:$0xff]   ;;  %v921_v37 = vld [vmem:[%s993_s26 + $0x50] ss:$8 sps:$4 sm:$0xff]  }
  0x17   : > { %502 = vmatpush1.bf16.msra.mxu0 %v881_v5  ;;  %861 = vmatpush1.bf16.msra.mxu1 %v881_v5  ;;  %v916_v34 = vld [vmem:[%s993_s26 + $0xc0] ss:$8 sps:$4 sm:$0xff]   ;;  %v919_v36 = vld [vmem:[%s993_s26 + $0xd4] ss:$8 sps:$4 sm:$0xff]   ;;  %v922_v38 = vld [vmem:[%s993_s26 + $0xd0] ss:$8 sps:$4 sm:$0xff]  }
  0x18   : > { %503 = vmatprep.subr.bf16.mxu0 %v943_v1  ;;  %852 = vmatprep.subr.bf16.mxu1 %v943_v1  ;;  %v923_v39 = vld [vmem:[%s993_s26 + $0x64] ss:$8 sps:$4 sm:$0xff]   ;;  %v927_v41 = vld [vmem:[%s993_s26 + $0x60] ss:$8 sps:$4 sm:$0xff]   ;;  %v929_v43 = vld [vmem:[%s993_s26 + $0x74] ss:$8 sps:$4 sm:$0xff]  }
  0x19   : > { %v925_v40 = vld [vmem:[%s993_s26 + $0xe4] ss:$8 sps:$4 sm:$0xff]   ;;  %v928_v42 = vld [vmem:[%s993_s26 + $0xe0] ss:$8 sps:$4 sm:$0xff]   ;;  %v931_v44 = vld [vmem:[%s993_s26 + $0xf4] ss:$8 sps:$4 sm:$0xff]  }
  0x1a   : > { %v933_v45 = vld [vmem:[%s993_s26 + $0x70] ss:$8 sps:$4 sm:$0xff]  }
  0x1b   : > { %504 = vmatpush1.bf16.msra.mxu0 %v882_v8  ;;  %862 = vmatpush1.bf16.msra.mxu1 %v882_v8  ;;  %v934_v46 = vld [vmem:[%s993_s26 + $0xf0] ss:$8 sps:$4 sm:$0xff]  }
  0x1c   : > { %505 = vmatprep.subr.bf16.mxu0 %v943_v1  ;;  %853 = vmatprep.subr.bf16.mxu1 %v943_v1 }
  0x1f   : > { %506 = vmatpush1.bf16.msra.mxu0 %v883_v9  ;;  %863 = vmatpush1.bf16.msra.mxu1 %v883_v9 }
  0x20   : > { %507 = vmatprep.subr.bf16.mxu0 %v943_v1  ;;  %854 = vmatprep.subr.bf16.mxu1 %v943_v1 }
  0x23   : > { %508 = vmatpush1.bf16.msra.mxu0 %v884_v10  ;;  %864 = vmatpush1.bf16.msra.mxu1 %v884_v10 }
  0x24   : > { %509 = vmatprep.subr.bf16.mxu0 %v943_v1  ;;  %855 = vmatprep.subr.bf16.mxu1 %v943_v1 }
  0x27   : > { %510 = vmatpush1.bf16.msra.mxu0 %v885_v13  ;;  %865 = vmatpush1.bf16.msra.mxu1 %v885_v13 }
  0x28   : > { %511 = vmatprep.subr.bf16.mxu0 %v943_v1  ;;  %856 = vmatprep.subr.bf16.mxu1 %v943_v1 }
  0x2b   : > { %512 = vmatpush1.bf16.msra.mxu0 %v491_v16  ;;  %866 = vmatpush1.bf16.msra.mxu1 %v491_v16 }
  0x2e   : > { %526 = vmatmul.mubr.bf16.vlgmr.msra.gmra.mrb[0].mxu0 %v887_v17  ;;  %590 = vmatmul.mubr.bf16.vlgmr.msra.gmra.mrb[0].mxu1 %v890_v18 }
  0x2f   : > { %829 = vmatprep.mubr.msk.bf16.mxu0 %vm437_vm0, %v893_v19  ;;  %837 = vmatprep.mubr.msk.bf16.mxu1 %vm437_vm0, %v895_v20 }
  0x36   : > { %534 = vmatmul.mubr.bf16.gmra.mrb[4].mxu0 %v897_v21  ;;  %598 = vmatmul.mubr.bf16.gmra.mrb[4].mxu1 %v898_v22 }
  0x37   : > { %830 = vmatprep.mubr.msk.bf16.mxu0 %vm437_vm0, %v899_v23  ;;  %838 = vmatprep.mubr.msk.bf16.mxu1 %vm437_vm0, %v901_v24 }
  0x3e   : > { %542 = vmatmul.mubr.bf16.gmra.mrb[8].mxu0 %v903_v25  ;;  %606 = vmatmul.mubr.bf16.gmra.mrb[8].mxu1 %v904_v26 }
  0x3f   : > { %831 = vmatprep.mubr.msk.bf16.mxu0 %vm437_vm0, %v905_v27  ;;  %839 = vmatprep.mubr.msk.bf16.mxu1 %vm437_vm0, %v907_v28 }
  0x46   : > { %550 = vmatmul.mubr.bf16.gmra.mrb[12].mxu0 %v909_v29  ;;  %614 = vmatmul.mubr.bf16.gmra.mrb[12].mxu1 %v910_v30 }
  0x47   : > { %832 = vmatprep.mubr.msk.bf16.mxu0 %vm437_vm0, %v911_v31  ;;  %840 = vmatprep.mubr.msk.bf16.mxu1 %vm437_vm0, %v913_v32 }
  0x4e   : > { %558 = vmatmul.mubr.bf16.gmra.mrb[16].mxu0 %v915_v33  ;;  %622 = vmatmul.mubr.bf16.gmra.mrb[16].mxu1 %v916_v34 }
  0x4f   : > { %833 = vmatprep.mubr.msk.bf16.mxu0 %vm437_vm0, %v917_v35  ;;  %841 = vmatprep.mubr.msk.bf16.mxu1 %vm437_vm0, %v919_v36 }
  0x56   : > { %566 = vmatmul.mubr.bf16.gmra.mrb[20].mxu0 %v921_v37  ;;  %630 = vmatmul.mubr.bf16.gmra.mrb[20].mxu1 %v922_v38 }
  0x57   : > { %834 = vmatprep.mubr.msk.bf16.mxu0 %vm437_vm0, %v923_v39  ;;  %842 = vmatprep.mubr.msk.bf16.mxu1 %vm437_vm0, %v925_v40 }
  0x5e   : > { %574 = vmatmul.mubr.bf16.gmra.mrb[24].mxu0 %v927_v41  ;;  %638 = vmatmul.mubr.bf16.gmra.mrb[24].mxu1 %v928_v42 }
  0x5f   : > { %835 = vmatprep.mubr.msk.bf16.mxu0 %vm437_vm0, %v929_v43  ;;  %843 = vmatprep.mubr.msk.bf16.mxu1 %vm437_vm0, %v931_v44 }
  0x66   : > { %582 = vmatmul.mubr.bf16.gmra.mrb[28].mxu0 %v933_v45  ;;  %646 = vmatmul.mubr.bf16.gmra.mrb[28].mxu1 %v934_v46 }
 0x101   : > { %v527_v48 = vpop.f32.mrb[0].mxu0  ;;  %v591_v49 = vpop.f32.mrb[0].mxu1 }
 0x102   : > { %v528_v50 = vadd.f32 %v1064_v47, %v527_v48  ;;  %v592_v51 = vadd.f32 %v1064_v47, %v591_v49  ;;  %v529_v52 = vpop.f32.mrb[1].mxu0  ;;  %v593_v53 = vpop.f32.mrb[1].mxu1 }
 0x103   : > { %v530_v54 = vpop.f32.mrb[2].mxu0  ;;  %v594_v55 = vpop.f32.mrb[2].mxu1 }
 0x104   : > { %v654_v56 = vmax.f32 %v528_v50, 0.0  ;;  %v670_v57 = vmax.f32 %v592_v51, 0.0  ;;  %v531_v58 = vadd.f32 %v1064_v47, %v530_v54  ;;  %v595_v59 = vadd.f32 %v1064_v47, %v594_v55  ;;  %v532_v60 = vpop.f32.mrb[3].mxu0  ;;  %v596_v61 = vpop.f32.mrb[3].mxu1 }
 0x106   : > { %687 = vst.msk [vmem:[%s1073_s17] sm:$0xff] %vm686_vm3, %v654_v56  ;;  %703 = vst.msk [vmem:[%s1073_s17 + $0x80] sm:$0xff] %vm686_vm3, %v670_v57  ;;  %v655_v62 = vmax.f32 %v531_v58, 0.0  ;;  %v671_v63 = vmax.f32 %v595_v59, 0.0 }
 0x108   : > { %688 = vst.msk [vmem:[%s1073_s17 + $0x8] sm:$0xff] %vm686_vm3, %v655_v62  ;;  %704 = vst.msk [vmem:[%s1073_s17 + $0x88] sm:$0xff] %vm686_vm3, %v671_v63 }
 0x109   : > { %v535_v0 = vpop.f32.mrb[4].mxu0  ;;  %v599_v1 = vpop.f32.mrb[4].mxu1 }
 0x10a   : > { %v536_v2 = vadd.f32 %v1064_v47, %v535_v0  ;;  %v600_v3 = vadd.f32 %v1064_v47, %v599_v1  ;;  %v537_v4 = vpop.f32.mrb[5].mxu0  ;;  %v601_v5 = vpop.f32.mrb[5].mxu1 }
 0x10b   : > { %v538_v6 = vpop.f32.mrb[6].mxu0  ;;  %v602_v7 = vpop.f32.mrb[6].mxu1 }
 0x10c   : > { %v656_v8 = vmax.f32 %v536_v2, 0.0  ;;  %v672_v9 = vmax.f32 %v600_v3, 0.0  ;;  %v539_v10 = vadd.f32 %v1064_v47, %v538_v6  ;;  %v603_v11 = vadd.f32 %v1064_v47, %v602_v7  ;;  %v540_v12 = vpop.f32.mrb[7].mxu0  ;;  %v604_v13 = vpop.f32.mrb[7].mxu1 }
 0x10e   : > { %689 = vst.msk [vmem:[%s1073_s17 + $0x10] sm:$0xff] %vm686_vm3, %v656_v8  ;;  %705 = vst.msk [vmem:[%s1073_s17 + $0x90] sm:$0xff] %vm686_vm3, %v672_v9  ;;  %v657_v14 = vmax.f32 %v539_v10, 0.0  ;;  %v673_v15 = vmax.f32 %v603_v11, 0.0 }
 0x110   : > { %690 = vst.msk [vmem:[%s1073_s17 + $0x18] sm:$0xff] %vm686_vm3, %v657_v14  ;;  %706 = vst.msk [vmem:[%s1073_s17 + $0x98] sm:$0xff] %vm686_vm3, %v673_v15 }
 0x111   : > { %v543_v16 = vpop.f32.mrb[8].mxu0  ;;  %v607_v17 = vpop.f32.mrb[8].mxu1 }
 0x112   : > { %v544_v18 = vadd.f32 %v1064_v47, %v543_v16  ;;  %v608_v19 = vadd.f32 %v1064_v47, %v607_v17  ;;  %v545_v20 = vpop.f32.mrb[9].mxu0  ;;  %v609_v21 = vpop.f32.mrb[9].mxu1 }
 0x113   : > { %v546_v22 = vpop.f32.mrb[10].mxu0  ;;  %v610_v23 = vpop.f32.mrb[10].mxu1 }
 0x114   : > { %v658_v24 = vmax.f32 %v544_v18, 0.0  ;;  %v674_v25 = vmax.f32 %v608_v19, 0.0  ;;  %v547_v26 = vadd.f32 %v1064_v47, %v546_v22  ;;  %v611_v27 = vadd.f32 %v1064_v47, %v610_v23  ;;  %v548_v28 = vpop.f32.mrb[11].mxu0  ;;  %v612_v29 = vpop.f32.mrb[11].mxu1 }
 0x116   : > { %691 = vst.msk [vmem:[%s1073_s17 + $0x20] sm:$0xff] %vm686_vm3, %v658_v24  ;;  %707 = vst.msk [vmem:[%s1073_s17 + $0xa0] sm:$0xff] %vm686_vm3, %v674_v25  ;;  %v659_v30 = vmax.f32 %v547_v26, 0.0  ;;  %v675_v31 = vmax.f32 %v611_v27, 0.0 }
 0x118   : > { %692 = vst.msk [vmem:[%s1073_s17 + $0x28] sm:$0xff] %vm686_vm3, %v659_v30  ;;  %708 = vst.msk [vmem:[%s1073_s17 + $0xa8] sm:$0xff] %vm686_vm3, %v675_v31 }
 0x119   : > { %v551_v32 = vpop.f32.mrb[12].mxu0  ;;  %v615_v33 = vpop.f32.mrb[12].mxu1 }
 0x11a   : > { %v552_v34 = vadd.f32 %v1064_v47, %v551_v32  ;;  %v616_v35 = vadd.f32 %v1064_v47, %v615_v33  ;;  %v553_v36 = vpop.f32.mrb[13].mxu0  ;;  %v617_v37 = vpop.f32.mrb[13].mxu1 }
 0x11b   : > { %v554_v38 = vpop.f32.mrb[14].mxu0  ;;  %v618_v39 = vpop.f32.mrb[14].mxu1 }
 0x11c   : > { %v660_v40 = vmax.f32 %v552_v34, 0.0  ;;  %v676_v41 = vmax.f32 %v616_v35, 0.0  ;;  %v555_v42 = vadd.f32 %v1064_v47, %v554_v38  ;;  %v619_v43 = vadd.f32 %v1064_v47, %v618_v39  ;;  %v556_v44 = vpop.f32.mrb[15].mxu0  ;;  %v620_v45 = vpop.f32.mrb[15].mxu1 }
 0x11e   : > { %693 = vst.msk [vmem:[%s1073_s17 + $0x30] sm:$0xff] %vm686_vm3, %v660_v40  ;;  %709 = vst.msk [vmem:[%s1073_s17 + $0xb0] sm:$0xff] %vm686_vm3, %v676_v41  ;;  %v661_v46 = vmax.f32 %v555_v42, 0.0  ;;  %v677_v48 = vmax.f32 %v619_v43, 0.0 }
 0x120   : > { %694 = vst.msk [vmem:[%s1073_s17 + $0x38] sm:$0xff] %vm686_vm3, %v661_v46  ;;  %710 = vst.msk [vmem:[%s1073_s17 + $0xb8] sm:$0xff] %vm686_vm3, %v677_v48 }
 0x121   : > { %v559_v49 = vpop.f32.mrb[16].mxu0  ;;  %v623_v50 = vpop.f32.mrb[16].mxu1 }
 0x122   : > { %v560_v51 = vadd.f32 %v1064_v47, %v559_v49  ;;  %v624_v52 = vadd.f32 %v1064_v47, %v623_v50  ;;  %v561_v53 = vpop.f32.mrb[17].mxu0  ;;  %v625_v54 = vpop.f32.mrb[17].mxu1 }
 0x123   : > { %v562_v55 = vpop.f32.mrb[18].mxu0  ;;  %v626_v56 = vpop.f32.mrb[18].mxu1 }
 0x124   : > { %v662_v57 = vmax.f32 %v560_v51, 0.0  ;;  %v678_v58 = vmax.f32 %v624_v52, 0.0  ;;  %v563_v59 = vadd.f32 %v1064_v47, %v562_v55  ;;  %v627_v60 = vadd.f32 %v1064_v47, %v626_v56  ;;  %v564_v61 = vpop.f32.mrb[19].mxu0  ;;  %v628_v62 = vpop.f32.mrb[19].mxu1 }
 0x126   : > { %695 = vst.msk [vmem:[%s1073_s17 + $0x40] sm:$0xff] %vm686_vm3, %v662_v57  ;;  %711 = vst.msk [vmem:[%s1073_s17 + $0xc0] sm:$0xff] %vm686_vm3, %v678_v58  ;;  %v663_v63 = vmax.f32 %v563_v59, 0.0  ;;  %v679_v0 = vmax.f32 %v627_v60, 0.0 }
 0x128   : > { %696 = vst.msk [vmem:[%s1073_s17 + $0x48] sm:$0xff] %vm686_vm3, %v663_v63  ;;  %712 = vst.msk [vmem:[%s1073_s17 + $0xc8] sm:$0xff] %vm686_vm3, %v679_v0 }
 0x129   : > { %v567_v1 = vpop.f32.mrb[20].mxu0  ;;  %v631_v2 = vpop.f32.mrb[20].mxu1 }
 0x12a   : > { %v568_v3 = vadd.f32 %v1064_v47, %v567_v1  ;;  %v632_v4 = vadd.f32 %v1064_v47, %v631_v2  ;;  %v569_v5 = vpop.f32.mrb[21].mxu0  ;;  %v633_v6 = vpop.f32.mrb[21].mxu1 }
 0x12b   : > { %v570_v7 = vpop.f32.mrb[22].mxu0  ;;  %v634_v8 = vpop.f32.mrb[22].mxu1 }
 0x12c   : > { %v664_v9 = vmax.f32 %v568_v3, 0.0  ;;  %v680_v10 = vmax.f32 %v632_v4, 0.0  ;;  %v571_v11 = vadd.f32 %v1064_v47, %v570_v7  ;;  %v635_v12 = vadd.f32 %v1064_v47, %v634_v8  ;;  %v572_v13 = vpop.f32.mrb[23].mxu0  ;;  %v636_v14 = vpop.f32.mrb[23].mxu1 }
 0x12e   : > { %697 = vst.msk [vmem:[%s1073_s17 + $0x50] sm:$0xff] %vm686_vm3, %v664_v9  ;;  %713 = vst.msk [vmem:[%s1073_s17 + $0xd0] sm:$0xff] %vm686_vm3, %v680_v10  ;;  %v665_v15 = vmax.f32 %v571_v11, 0.0  ;;  %v681_v16 = vmax.f32 %v635_v12, 0.0 }
 0x130   : > { %698 = vst.msk [vmem:[%s1073_s17 + $0x58] sm:$0xff] %vm686_vm3, %v665_v15  ;;  %714 = vst.msk [vmem:[%s1073_s17 + $0xd8] sm:$0xff] %vm686_vm3, %v681_v16 }
 0x131   : > { %v575_v17 = vpop.f32.mrb[24].mxu0  ;;  %v639_v18 = vpop.f32.mrb[24].mxu1 }
 0x132   : > { %v576_v19 = vadd.f32 %v1064_v47, %v575_v17  ;;  %v640_v20 = vadd.f32 %v1064_v47, %v639_v18  ;;  %v577_v21 = vpop.f32.mrb[25].mxu0  ;;  %v641_v22 = vpop.f32.mrb[25].mxu1 }
 0x133   : > { %v578_v23 = vpop.f32.mrb[26].mxu0  ;;  %v642_v24 = vpop.f32.mrb[26].mxu1 }
 0x134   : > { %v666_v25 = vmax.f32 %v576_v19, 0.0  ;;  %v682_v26 = vmax.f32 %v640_v20, 0.0  ;;  %v579_v27 = vadd.f32 %v1064_v47, %v578_v23  ;;  %v643_v28 = vadd.f32 %v1064_v47, %v642_v24  ;;  %v580_v29 = vpop.f32.mrb[27].mxu0  ;;  %v644_v30 = vpop.f32.mrb[27].mxu1 }
 0x136   : > { %699 = vst.msk [vmem:[%s1073_s17 + $0x60] sm:$0xff] %vm686_vm3, %v666_v25  ;;  %715 = vst.msk [vmem:[%s1073_s17 + $0xe0] sm:$0xff] %vm686_vm3, %v682_v26  ;;  %v667_v31 = vmax.f32 %v579_v27, 0.0  ;;  %v683_v32 = vmax.f32 %v643_v28, 0.0 }
 0x138   : > { %700 = vst.msk [vmem:[%s1073_s17 + $0x68] sm:$0xff] %vm686_vm3, %v667_v31  ;;  %716 = vst.msk [vmem:[%s1073_s17 + $0xe8] sm:$0xff] %vm686_vm3, %v683_v32 }
 0x139   : > { %v583_v33 = vpop.f32.mrb[28].mxu0  ;;  %v647_v34 = vpop.f32.mrb[28].mxu1 }
 0x13a   : > { %v584_v35 = vadd.f32 %v1064_v47, %v583_v33  ;;  %v648_v36 = vadd.f32 %v1064_v47, %v647_v34  ;;  %v585_v37 = vpop.f32.mrb[29].mxu0  ;;  %v649_v38 = vpop.f32.mrb[29].mxu1 }
 0x13b   : > { %v586_v39 = vpop.f32.mrb[30].mxu0  ;;  %v650_v40 = vpop.f32.mrb[30].mxu1 }
 0x13c   : > { %v668_v41 = vmax.f32 %v584_v35, 0.0  ;;  %v684_v42 = vmax.f32 %v648_v36, 0.0  ;;  %v587_v43 = vadd.f32 %v1064_v47, %v586_v39  ;;  %v651_v44 = vadd.f32 %v1064_v47, %v650_v40  ;;  %v588_v45 = vpop.f32.mrb[31].mxu0  ;;  %v652_v46 = vpop.f32.mrb[31].mxu1 }
 0x13e   : > { %701 = vst.msk [vmem:[%s1073_s17 + $0x70] sm:$0xff] %vm686_vm3, %v668_v41  ;;  %717 = vst.msk [vmem:[%s1073_s17 + $0xf0] sm:$0xff] %vm686_vm3, %v684_v42  ;;  %v669_v48 = vmax.f32 %v587_v43, 0.0  ;;  %v685_v49 = vmax.f32 %v651_v44, 0.0 }
 0x140   : > { %702 = vst.msk [vmem:[%s1073_s17 + $0x78] sm:$0xff] %vm686_vm3, %v669_v48  ;;  %718 = vst.msk [vmem:[%s1073_s17 + $0xf8] sm:$0xff] %vm686_vm3, %v685_v49 }
 0x141 PF: > { %s13_s12 = sadd.s32 1, %s941_s12  }
 0x142   : > { %p10_p4 = scmp.ge.s32.totalorder %s13_s12, 4  }
 0x144   :  { %12 = sbr.rel (!%p10_p4) target bundleno = 1 (0x1), region = 62 }

// kernel: model_extractor_forward.3
= control target key start
LH: loop header
LB: loop body
LE: loop exit
PB: predicated region body
PF: predicated region fallthrough
CT: control target
= control target key end

     0   :  { %6 = vsyncpa [#allocation3], 0  ;;  %s2734_s0 = inlined_call_operand.vmem [shape: f32[2,17,17,64], index: 0, kind: input, shape index: {}]   ;;  %s2735_s1 = inlined_call_operand.hbm [shape: f32[2,8,8,64], index: 1, kind: output, shape index: {}]  }
   0x1   :  { %8 = vsyncpa [#allocation3 + $0x1], 0  ;;  %s1538_s6 = smov 0   ;;  %s1540_s7 = smov 0  }
   0x2   :  { %s1542_s8 = smov 0   ;;  %s1544_s9 = smov 0  }
   0x3 LB: > { %s1559_s10 = sadd.s32 4294967295, %s1522_s9   ;;  %s1405_s11 = sadd.s32 4294967294, %s1522_s9   ;;  %s1522_s9 = sphi %s1544_s9, %s2829_s9   ;;  %s1518_s8 = sphi %s1542_s8, %s2828_s8   ;;  %s1514_s7 = sphi %s1540_s7, %s2827_s7   ;;  %s1510_s6 = sphi %s1538_s6, %s2826_s6  }
   0x4   : > { %s1563_s12 = sadd.s32 1, %s1522_s9   ;;  %s47_s13 = sadd.s32 1, %s1518_s8 }
   0x5   : > { %s44_s14 = ssub.s32 %s1522_s9, %s1563_s12  ;;  %p57_p0 = scmp.ne.s32.totalorder %s1518_s8, %s1514_s7 }
   0x6   : > { %p45_p1 = scmp.eq.s32.totalorder %s44_s14, 0  ;;  %p58_p2 = scmp.eq.s32.totalorder %s1559_s10, 1 }
   0x7   : > { %p63_p3 = scmp.ne.s32.totalorder %s1514_s7, %s1510_s6  ;;  %p64_p4 = scmp.eq.s32.totalorder %s1405_s11, 1 }
   0x8   : > { %s1574_s15 = scalar_select %p45_p1, %s1518_s8, %s47_s13  }
   0x9   : > { %p1576_p5 = por %p58_p2, %p57_p0  ;;  %p1580_p6 = por %p64_p4, %p63_p3 }
   0xa   : > { %p1408_p7 = scmp.ge.s32.totalorder %s1522_s9, 1  ;;  %p90_p8 = scmp.lt.s32.totalorder %s1522_s9, 3 }
   0xc   : > { %p91_p9 = pnand %p1408_p7, %p90_p8 }
   0xe   : > { %94 = sbr.rel (%p91_p9) target bundleno = 242 (0xf2), region = 24 }
  0x15   : > { %p110_p10 = scmp.lt.s32.totalorder %s1559_s10, 1  ;;  %v1524_v0 = vmov 1983009808   ;;  %v405_v2 = vlaneseq  ;;  %vm214_vm0 = vcmask 523264   ;;  %vm221_vm1 = vcmask 516096   ;;  %s107_s23 = sand.u32 1, %s1514_s7  }
  0x16   : > { %v403_v1 = vunpack.c.l.s4 %v1524_v0  ;;  %vm312_vm2 = vcmask 1046528   ;;  %vm737_vm3 = vcmask 517120   ;;  %vm1250_vm4 = vcmask 1041409   ;;  %s1409_s24 = sshll.u32 %s107_s23, 6  ;;  %s1416_s26 = sshll.u32 %s1559_s10, 10 }
  0x17   : > { %s111_s18 = scalar_select %p110_p10, %s1559_s10, 1  ;;  %v406_v4 = vshrl.u32 %v405_v2, 7  ;;  %vm1252_vm5 = vcmask 1042434   ;;  %vm1254_vm6 = vcmask 1043459   ;;  %vm1256_vm7 = vcmask 1044484  }
  0x18   : > { %v404_v3 = vunpack.c.0.s8 %v403_v1  ;;  %vm1258_vm8 = vcmask 1045509   ;;  %vm1260_vm9 = vcmask 1046534   ;;  %vm1262_vm10 = vcmask 1047559   ;;  %s2582_s25 = scalar_lea.vmem [#allocation2], %s1409_s24  ;;  %s2675_s30 = scalar_lea.hbm %s2735_s1, %s1416_s26 }
  0x19   : > { %s1417_s19 = smul.u32 408, %s111_s18  ;;  %s1343_s27 = sshll.u32 %s2582_s25, 4  ;;  %s2677_s27 = int_to_ptr.vmem [resolvable:$true] %s1343_s27 }
  0x1a   : > { %v1612_v15 = vsub.s32 %v404_v3, %v406_v4  ;;  %s2693_s2 = scalar_lea.sflag [#allocation3], %s107_s23  ;;  %s1460_s3 = scalar_lea.vmem %s2677_s27, 1024 }
  0x1b   : > { %s1591_s22 = scalar_lea.vmem %s2734_s0, %s1417_s19  ;;  %p1461_p11 = scmp.ne.s32.totalorder %s2677_s27, %s1460_s3 }
  0x1c   : > { %v115_v5 = vld [vmem:[%s1591_s22] sm:$0xff]  ;;  %v116_v6 = vld [vmem:[%s1591_s22 + $0x8] sm:$0xff]  ;;  %v1596_v7 = vld [vmem:[%s1591_s22 + $0x10] sm:$0x1]  ;;  %s1525_s4 = smov [#allocation2]  }
  0x1d   : > { %v118_v8 = vld [vmem:[%s1591_s22 + $0x18] sm:$0xff]  ;;  %v119_v9 = vld [vmem:[%s1591_s22 + $0x20] sm:$0xff]  ;;  %v1601_v10 = vld [vmem:[%s1591_s22 + $0x28] sm:$0x1]  ;;  %p1462_p12 = pnand %p1461_p11, %p1576_p5  ;;  %s1464_s5 = sshll.u32 %s1525_s4, 4  ;;  %s1465_s5 = int_to_ptr.vmem [resolvable:$false] %s1464_s5 }
  0x1e   : > { %v1604_v11 = vld [vmem:[%s1591_s22 + $0x30] sm:$0xff]  ;;  %v1607_v12 = vld [vmem:[%s1591_s22 + $0x38] sm:$0xff]  ;;  %v1610_v13 = vld [vmem:[%s1591_s22 + $0x40] sm:$0x1]  ;;  %v166_v14 = vmax.f32 %v115_v5, %v118_v8  ;;  %v167_v19 = vmax.f32 %v116_v6, %v119_v9  ;;  %v168_v20 = vmax.f32 %v1596_v7, %v1601_v10  ;;  %s1466_s10 = scalar_lea.vmem %s1465_s5, 2048  ;;  %p1467_p0 = scmp.lt.s32.totalorder %s2677_s27, %s1465_s5 }
  0x1f   : > { %v1615_v16 = vld [vmem:[%s1591_s22 + $0x48] sm:$0xff]  ;;  %v1618_v17 = vld [vmem:[%s1591_s22 + $0x50] sm:$0xff]  ;;  %v1621_v18 = vld [vmem:[%s1591_s22 + $0x58] sm:$0x1]  ;;  %v169_v21 = vmax.f32 %v118_v8, %v1604_v11  ;;  %v170_v22 = vmax.f32 %v119_v9, %v1607_v12  ;;  %v171_v26 = vmax.f32 %v1601_v10, %v1610_v13  ;;  %p1463_p13 = pneg %p1462_p12  ;;  %p1468_p1 = scmp.lt.s32.totalorder %s1466_s10, %s1460_s3 }
  0x20   : > { %v1628_v23 = vld [vmem:[%s1591_s22 + $0x60] sm:$0xff]  ;;  %v1631_v24 = vld [vmem:[%s1591_s22 + $0x68] sm:$0xff]  ;;  %v1634_v25 = vld [vmem:[%s1591_s22 + $0x70] sm:$0x1]  ;;  %v172_v27 = vmax.f32 %v1604_v11, %v1615_v16  ;;  %v173_v28 = vmax.f32 %v1607_v12, %v1618_v17  ;;  %v215_v29 = vsel %vm214_vm0, %v166_v14, -inf  ;;  %v174_v33 = vmax.f32 %v1610_v13, %v1621_v18 }
  0x21   : > { %v1644_v30 = vld [vmem:[%s1591_s22 + $0x78] sm:$0xff]  ;;  %v1647_v31 = vld [vmem:[%s1591_s22 + $0x80] sm:$0xff]  ;;  %v1650_v32 = vld [vmem:[%s1591_s22 + $0x88] sm:$0x1]  ;;  %v175_v34 = vmax.f32 %v1615_v16, %v1628_v23  ;;  %v176_v35 = vmax.f32 %v1618_v17, %v1631_v24  ;;  %v216_v36 = vsel %vm214_vm0, %v169_v21, -inf  ;;  %v177_v40 = vmax.f32 %v1621_v18, %v1634_v25  ;;  %p1469_p2 = por %p1468_p1, %p1467_p0 }
  0x22   : > { %v1660_v37 = vld [vmem:[%s1591_s22 + $0x90] sm:$0xff]  ;;  %v1663_v38 = vld [vmem:[%s1591_s22 + $0x98] sm:$0xff]  ;;  %v1666_v39 = vld [vmem:[%s1591_s22 + $0xa0] sm:$0x1]  ;;  %v1689_v49 = vmax.f32 %v215_v29, %v216_v36  ;;  %v218_v50 = vsel %vm214_vm0, %v167_v19, -inf  ;;  %v219_v57 = vsel %vm214_vm0, %v170_v22, -inf }
  0x23   : > { %v1677_v44 = vld [vmem:[%s1591_s22 + $0xa8] sm:$0xff]  ;;  %v1680_v45 = vld [vmem:[%s1591_s22 + $0xb0] sm:$0xff]  ;;  %v1683_v46 = vld [vmem:[%s1591_s22 + $0xb8] sm:$0x1]  ;;  %v1738_v6 = vmax.f32 %v218_v50, %v219_v57  ;;  %v1741_v7 = vsel %vm221_vm1, %v168_v20, -inf  ;;  %v1759_v20 = vsel %vm221_vm1, %v171_v26, -inf  ;;  %v2741_v18 = vmax.f32 %v1647_v31, %v1663_v38  ;;  %p1470_p3 = pnand %p1469_p2, %p1463_p13 }
  0x24   : > { %v1693_v51 = vld [vmem:[%s1591_s22 + $0xc0] sm:$0xff]  ;;  %v1696_v52 = vld [vmem:[%s1591_s22 + $0xc8] sm:$0xff]  ;;  %v1699_v53 = vld [vmem:[%s1591_s22 + $0xd0] sm:$0x1]  ;;  %v225_v26 = vsel %vm214_vm0, %v172_v27, -inf  ;;  %v226_v27 = vsel %vm214_vm0, %v175_v34, -inf }
  0x25   : > { %v1709_v58 = vld [vmem:[%s1591_s22 + $0xd8] sm:$0xff]  ;;  %v1712_v59 = vld [vmem:[%s1591_s22 + $0xe0] sm:$0xff]  ;;  %v1715_v60 = vld [vmem:[%s1591_s22 + $0xe8] sm:$0x1]  ;;  %v1846_v42 = vmax.f32 %v225_v26, %v226_v27  ;;  %v1868_v12 = vsel %vm221_vm1, %v174_v33, -inf  ;;  %v2740_v33 = vmax.f32 %v1631_v24, %v1647_v31  ;;  %v2744_v31 = vmax.f32 %v1660_v37, %v1677_v44 }
  0x26   : > { %v1726_v1 = vld [vmem:[%s1591_s22 + $0xf0] sm:$0xff]  ;;  %v1729_v2 = vld [vmem:[%s1591_s22 + $0xf8] sm:$0xff]  ;;  %v1732_v3 = vld [vmem:[%s1591_s22 + $0x100] sm:$0x1] }
  0x27   : > { %v1744_v8 = vld [vmem:[%s1591_s22 + $0x108] sm:$0xff]  ;;  %v1747_v9 = vld [vmem:[%s1591_s22 + $0x110] sm:$0xff]  ;;  %v1750_v10 = vld [vmem:[%s1591_s22 + $0x118] sm:$0x1]  ;;  %v243_v27 = vsel %vm214_vm0, %v2744_v31, -inf }
  0x28   : > { %v1762_v22 = vld [vmem:[%s1591_s22 + $0x120] sm:$0xff]  ;;  %v1765_v29 = vld [vmem:[%s1591_s22 + $0x128] sm:$0xff]  ;;  %v1768_v36 = vld [vmem:[%s1591_s22 + $0x130] sm:$0x1] }
  0x29   : > { %v1779_v21 = vld [vmem:[%s1591_s22 + $0x138] sm:$0xff]  ;;  %v1782_v5 = vld [vmem:[%s1591_s22 + $0x140] sm:$0xff]  ;;  %v1785_v19 = vld [vmem:[%s1591_s22 + $0x148] sm:$0x1]  ;;  %v199_v50 = vmax.f32 %v1744_v8, %v1762_v22  ;;  %v201_v57 = vmax.f32 %v1750_v10, %v1768_v36 }
  0x2a   : > { %v1798_v4 = vld [vmem:[%s1591_s22 + $0x150] sm:$0xff]  ;;  %v1801_v0 = vld [vmem:[%s1591_s22 + $0x158] sm:$0xff]  ;;  %v1804_v61 = vld [vmem:[%s1591_s22 + $0x160] sm:$0x1]  ;;  %v202_v14 = vmax.f32 %v1762_v22, %v1779_v21  ;;  %v204_v55 = vmax.f32 %v1768_v36, %v1785_v19 }
  0x2b   : > { %v1817_v63 = vld [vmem:[%s1591_s22 + $0x168] sm:$0xff]  ;;  %v1820_v56 = vld [vmem:[%s1591_s22 + $0x170] sm:$0xff]  ;;  %v1823_v62 = vld [vmem:[%s1591_s22 + $0x178] sm:$0x1]  ;;  %v205_v22 = vmax.f32 %v1779_v21, %v1798_v4  ;;  %v206_v11 = vmax.f32 %v1782_v5, %v1801_v0  ;;  %v207_v16 = vmax.f32 %v1785_v19, %v1804_v61  ;;  %v228_v21 = vsel %vm214_vm0, %v173_v28, -inf }
  0x2c   : > { %v1834_v54 = vld [vmem:[%s1591_s22 + $0x180] sm:$0xff]  ;;  %v1837_v34 = vld [vmem:[%s1591_s22 + $0x188] sm:$0xff]  ;;  %v1840_v43 = vld [vmem:[%s1591_s22 + $0x190] sm:$0x1]  ;;  %v208_v48 = vmax.f32 %v1798_v4, %v1817_v63  ;;  %v209_v36 = vmax.f32 %v1801_v0, %v1820_v56  ;;  %v210_v19 = vmax.f32 %v1804_v61, %v1823_v62  ;;  %v229_v0 = vsel %vm214_vm0, %v176_v35, -inf }
  0x2d   : > { %v211_v47 = vmax.f32 %v1817_v63, %v1834_v54  ;;  %v212_v41 = vmax.f32 %v1820_v56, %v1837_v34  ;;  %v213_v4 = vmax.f32 %v1823_v62, %v1840_v43  ;;  %v232_v28 = vsel %vm221_vm1, %v177_v40, -inf }
  0x2e   : > { %v2738_v54 = vmax.f32 %v1628_v23, %v1644_v30  ;;  %v1878_v35 = vmax.f32 %v228_v21, %v229_v0  ;;  %v2739_v43 = vmax.f32 %v1644_v30, %v1660_v37  ;;  %v237_v56 = vsel %vm214_vm0, %v2740_v33, -inf }
  0x2f   : > { %v238_v40 = vsel %vm214_vm0, %v2741_v18, -inf  ;;  %v233_v23 = vmax.f32 %v1868_v12, %v232_v28  ;;  %v2742_v62 = vmax.f32 %v1634_v25, %v1650_v32  ;;  %v2743_v63 = vmax.f32 %v1650_v32, %v1666_v39 }
  0x30   : > { %v234_v17 = vsel %vm214_vm0, %v2738_v54, -inf  ;;  %v235_v13 = vsel %vm214_vm0, %v2739_v43, -inf  ;;  %v1903_v26 = vmax.f32 %v237_v56, %v238_v40  ;;  %v2745_v34 = vmax.f32 %v1677_v44, %v1693_v51 }
  0x31   : > { %v1893_v61 = vmax.f32 %v234_v17, %v235_v13  ;;  %v240_v30 = vsel %vm221_vm1, %v2742_v62, -inf  ;;  %v241_v24 = vsel %vm221_vm1, %v2743_v63, -inf  ;;  %v2746_v25 = vmax.f32 %v1663_v38, %v1680_v45 }
  0x32   : > { %v244_v21 = vsel %vm214_vm0, %v2745_v34, -inf  ;;  %v242_v32 = vmax.f32 %v240_v30, %v241_v24  ;;  %v2747_v12 = vmax.f32 %v1680_v45, %v1696_v52  ;;  %v2748_v37 = vmax.f32 %v1666_v39, %v1683_v46 }
  0x33   : > { %v246_v0 = vsel %vm214_vm0, %v2746_v25, -inf  ;;  %v2749_v44 = vmax.f32 %v1683_v46, %v1699_v53  ;;  %v1929_v43 = vmax.f32 %v243_v27, %v244_v21  ;;  %v2750_v13 = vmax.f32 %v1693_v51, %v1709_v58 }
  0x34   : > { %v247_v28 = vsel %vm214_vm0, %v2747_v12, -inf  ;;  %v249_v54 = vsel %vm221_vm1, %v2748_v37, -inf  ;;  %v2751_v33 = vmax.f32 %v1709_v58, %v1726_v1  ;;  %v2752_v46 = vmax.f32 %v1696_v52, %v1712_v59 }
  0x35   : > { %v250_v17 = vsel %vm221_vm1, %v2749_v44, -inf  ;;  %v1931_v38 = vmax.f32 %v246_v0, %v247_v28  ;;  %v252_v45 = vsel %vm214_vm0, %v2750_v13, -inf  ;;  %v2753_v40 = vmax.f32 %v1712_v59, %v1729_v2 }
  0x36   : > { %v253_v39 = vsel %vm214_vm0, %v2751_v33, -inf  ;;  %v251_v56 = vmax.f32 %v249_v54, %v250_v17  ;;  %v255_v18 = vsel %vm214_vm0, %v2752_v46, -inf  ;;  %v2754_v51 = vmax.f32 %v1699_v53, %v1715_v60 }
  0x37   : > { %v256_v62 = vsel %vm214_vm0, %v2753_v40, -inf  ;;  %v1953_v58 = vmax.f32 %v252_v45, %v253_v39  ;;  %v2755_v63 = vmax.f32 %v1715_v60, %v1732_v3  ;;  %v2756_v24 = vmax.f32 %v1726_v1, %v1744_v8 }
  0x38   : > { %v258_v30 = vsel %vm221_vm1, %v2754_v51, -inf  ;;  %v262_v31 = vsel %vm214_vm0, %v199_v50, -inf  ;;  %v1964_v27 = vmax.f32 %v255_v18, %v256_v62  ;;  %v2757_v34 = vmax.f32 %v1729_v2, %v1747_v9 }
  0x39   : > { %v259_v52 = vsel %vm221_vm1, %v2755_v63, -inf  ;;  %v261_v59 = vsel %vm214_vm0, %v2756_v24, -inf  ;;  %v2758_v60 = vmax.f32 %v1747_v9, %v1765_v29  ;;  %v2759_v1 = vmax.f32 %v1732_v3, %v1750_v10 }
  0x3a   : > { %v260_v53 = vmax.f32 %v258_v30, %v259_v52  ;;  %v264_v21 = vsel %vm214_vm0, %v2757_v34, -inf  ;;  %v1974_v0 = vmax.f32 %v261_v59, %v262_v31  ;;  %v268_v50 = vsel %vm221_vm1, %v201_v57, -inf }
  0x3b   : > { %v265_v25 = vsel %vm214_vm0, %v2758_v60, -inf  ;;  %v267_v8 = vsel %vm221_vm1, %v2759_v1, -inf  ;;  %v270_v12 = vsel %vm214_vm0, %v202_v14, -inf  ;;  %v271_v2 = vsel %vm214_vm0, %v205_v22, -inf }
  0x3c   : > { %v1982_v28 = vmax.f32 %v264_v21, %v265_v25  ;;  %v2760_v9 = vmax.f32 %v1765_v29, %v1782_v5  ;;  %v274_v54 = vsel %vm214_vm0, %v206_v11, -inf  ;;  %v269_v44 = vmax.f32 %v267_v8, %v268_v50 }
  0x3d   : > { %v1990_v17 = vmax.f32 %v270_v12, %v271_v2  ;;  %v276_v3 = vsel %vm221_vm1, %v204_v55, -inf  ;;  %v277_v10 = vsel %vm221_vm1, %v207_v16, -inf  ;;  %v279_v14 = vsel %vm214_vm0, %v208_v48, -inf }
  0x3e   : > { %v273_v37 = vsel %vm214_vm0, %v2760_v9, -inf  ;;  %v280_v22 = vsel %vm214_vm0, %v211_v47, -inf  ;;  %v282_v13 = vsel %vm214_vm0, %v209_v36, -inf  ;;  %v278_v5 = vmax.f32 %v276_v3, %v277_v10 }
  0x3f   : > { %v1994_v57 = vmax.f32 %v273_v37, %v274_v54  ;;  %v283_v29 = vsel %vm214_vm0, %v212_v41, -inf  ;;  %v285_v11 = vsel %vm221_vm1, %v210_v19, -inf  ;;  %v286_v45 = vsel %vm221_vm1, %v213_v4, -inf }
  0x40   : > { %v281_v33 = vmax.f32 %v279_v14, %v280_v22  ;;  %v2002_v39 = vmax.f32 %v282_v13, %v283_v29  ;;  %v313_v55 = vrot.slane %v1689_v49, 1  ;;  %v314_v16 = vrot.slane %v1738_v6, 1 }
  0x41   : > { %v2761_v48 = vmax.f32 %v1741_v7, %v1759_v20  ;;  %v318_v36 = vrot.slane %v1846_v42, 1  ;;  %v319_v46 = vrot.slane %v1878_v35, 1  ;;  %v321_v41 = vrot.slane %v233_v23, 1 }
  0x42   : > { %v287_v18 = vmax.f32 %v285_v11, %v286_v45  ;;  %v323_v19 = vrot.slane %v1893_v61, 1  ;;  %v324_v4 = vrot.slane %v1903_v26, 1  ;;  %v326_v40 = vrot.slane %v242_v32, 1 }
  0x43   : > { %v316_v47 = vrot.slane %v2761_v48, 1  ;;  %v315_v62 = vsel %vm312_vm2, %v313_v55, %v314_v16  ;;  %v320_v30 = vsel %vm312_vm2, %v318_v36, %v319_v46  ;;  %v328_v7 = vrot.slane %v1929_v43, 1 }
  0x44   : > { %v322_v20 = vsel %vm312_vm2, %v319_v46, %v321_v41  ;;  %v325_v63 = vsel %vm312_vm2, %v323_v19, %v324_v4  ;;  %v329_v23 = vrot.slane %v1931_v38, 1  ;;  %v331_v52 = vrot.slane %v251_v56, 1 }
  0x45   : > { %v317_v51 = vsel %vm312_vm2, %v314_v16, %v316_v47  ;;  %v333_v24 = vrot.slane %v1953_v58, 1  ;;  %v334_v59 = vrot.slane %v1964_v27, 1  ;;  %v336_v32 = vrot.slane %v260_v53, 1 }
  0x46   : > { %v338_v31 = vrot.slane %v1974_v0, 1  ;;  %v327_v34 = vsel %vm312_vm2, %v324_v4, %v326_v40  ;;  %v330_v21 = vsel %vm312_vm2, %v328_v7, %v329_v23  ;;  %v339_v60 = vrot.slane %v1982_v28, 1 }
  0x47   : > { %v341_v25 = vrot.slane %v269_v44, 1  ;;  %v332_v1 = vsel %vm312_vm2, %v329_v23, %v331_v52  ;;  %v335_v8 = vsel %vm312_vm2, %v333_v24, %v334_v59  ;;  %v343_v56 = vrot.slane %v1990_v17, 1 }
  0x48   : > { %v344_v50 = vrot.slane %v1994_v57, 1  ;;  %v337_v12 = vsel %vm312_vm2, %v334_v59, %v336_v32  ;;  %v340_v53 = vsel %vm312_vm2, %v338_v31, %v339_v60  ;;  %v346_v2 = vrot.slane %v278_v5, 1 }
  0x49   : > { %v348_v9 = vrot.slane %v281_v33, 1  ;;  %v342_v37 = vsel %vm312_vm2, %v339_v60, %v341_v25  ;;  %v349_v44 = vrot.slane %v2002_v39, 1  ;;  %v351_v3 = vrot.slane %v287_v18, 1 }
  0x4a   : > { %v345_v54 = vsel %vm312_vm2, %v343_v56, %v344_v50  ;;  %v347_v10 = vsel %vm312_vm2, %v344_v50, %v346_v2  ;;  %v369_v14 = vmax.f32 %v1689_v49, %v315_v62  ;;  %v370_v22 = vmax.f32 %v1738_v6, %v317_v51 }
  0x4b   : > { %v371_v13 = vmax.f32 %v1846_v42, %v320_v30  ;;  %v350_v29 = vsel %vm312_vm2, %v348_v9, %v349_v44  ;;  %v352_v5 = vsel %vm312_vm2, %v349_v44, %v351_v3  ;;  %v372_v11 = vmax.f32 %v1878_v35, %v322_v20 }
  0x4c   : > { %v373_v45 = vmax.f32 %v1893_v61, %v325_v63  ;;  %v374_v55 = vmax.f32 %v1903_v26, %v327_v34  ;;  %v375_v16 = vmax.f32 %v1929_v43, %v330_v21  ;;  %v376_v48 = vmax.f32 %v1931_v38, %v332_v1 }
  0x4d   : > { %v377_v49 = vmax.f32 %v1953_v58, %v335_v8  ;;  %v378_v6 = vmax.f32 %v1964_v27, %v337_v12  ;;  %v379_v42 = vmax.f32 %v1974_v0, %v340_v53  ;;  %v380_v47 = vmax.f32 %v1982_v28, %v342_v37 }
  0x4e   : > { %v2051_v36 = vmax.f32 %v1990_v17, %v345_v54  ;;  %v2054_v35 = vmax.f32 %v1994_v57, %v347_v10  ;;  %v2056_v61 = vmax.f32 %v281_v33, %v350_v29  ;;  %v401_v26 = vcombine.high %v369_v14, %v369_v14 }
  0x4f   : > { %v2059_v43 = vrot.slane %v369_v14, %v1612_v15  ;;  %v418_v38 = vcombine.high %v370_v22, %v370_v22  ;;  %v2062_v58 = vrot.slane %v370_v22, %v1612_v15  ;;  %v435_v27 = vcombine.high %v371_v13, %v371_v13 }
  0x50   : > { %v2065_v0 = vrot.slane %v371_v13, %v1612_v15  ;;  %v2068_v28 = vmax.f32 %v2002_v39, %v352_v5  ;;  %v2071_v17 = vrot.slane %v401_v26, %v1612_v15  ;;  %v452_v57 = vcombine.high %v372_v11, %v372_v11 }
  0x51   : > { %v2074_v33 = vrot.slane %v372_v11, %v1612_v15  ;;  %v416_v46 = vcombine.high %v2059_v43, %v2059_v43  ;;  %v2079_v41 = vrot.slane %v418_v38, %v1612_v15  ;;  %v433_v18 = vcombine.high %v2062_v58, %v2062_v58 }
  0x52   : > { %v2084_v19 = vrot.slane %v435_v27, %v1612_v15  ;;  %v417_v39 = vcombine.high %v2071_v17, %v2071_v17  ;;  %v450_v4 = vcombine.high %v2065_v0, %v2065_v0  ;;  %v2091_v40 = vrot.slane %v452_v57, %v1612_v15 }
  0x53   : > { %v469_v62 = vcombine.high %v373_v45, %v373_v45  ;;  %v434_v51 = vcombine.high %v2079_v41, %v2079_v41  ;;  %v467_v30 = vcombine.high %v2074_v33, %v2074_v33  ;;  %v2098_v7 = vrot.slane %v373_v45, %v1612_v15 }
  0x54   : > { %v486_v20 = vcombine.high %v374_v55, %v374_v55  ;;  %v451_v63 = vcombine.high %v2084_v19, %v2084_v19  ;;  %v2106_v52 = vrot.slane %v374_v55, %v1612_v15  ;;  %v503_v24 = vcombine.high %v375_v16, %v375_v16 }
  0x55   : > { %v2103_v23 = vrot.slane %v469_v62, %v1612_v15  ;;  %v468_v59 = vcombine.high %v2091_v40, %v2091_v40  ;;  %v2114_v31 = vrot.slane %v375_v16, %v1612_v15  ;;  %v520_v34 = vcombine.high %v376_v48, %v376_v48 }
  0x56   : > { %v2111_v32 = vrot.slane %v486_v20, %v1612_v15  ;;  %v2121_v25 = vrot.slane %v503_v24, %v1612_v15  ;;  %v2124_v1 = vrot.slane %v376_v48, %v1612_v15  ;;  %v537_v12 = vcombine.high %v377_v49, %v377_v49 }
  0x57   : > { %v2131_v50 = vrot.slane %v520_v34, %v1612_v15  ;;  %v2138_v9 = vrot.slane %v377_v49, %v1612_v15  ;;  %v554_v37 = vcombine.high %v378_v6, %v378_v6  ;;  %v2146_v3 = vrot.slane %v378_v6, %v1612_v15 }
  0x58   : > { %v2143_v44 = vrot.slane %v537_v12, %v1612_v15  ;;  %v571_v10 = vcombine.high %v379_v42, %v379_v42  ;;  %v2154_v13 = vrot.slane %v379_v42, %v1612_v15  ;;  %v588_v29 = vcombine.high %v380_v47, %v380_v47 }
  0x59   : > { %v2151_v22 = vrot.slane %v554_v37, %v1612_v15  ;;  %v2164_v55 = vrot.slane %v380_v47, %v1612_v15  ;;  %v605_v6 = vcombine.high %v2051_v36, %v2051_v36  ;;  %v2181_v47 = vrot.slane %v2051_v36, %v1612_v15 }
  0x5a   : > { %v2161_v45 = vrot.slane %v571_v10, %v1612_v15  ;;  %v2171_v49 = vrot.slane %v588_v29, %v1612_v15  ;;  %v622_v38 = vcombine.high %v2054_v35, %v2054_v35  ;;  %v2192_v62 = vrot.slane %v2054_v35, %v1612_v15 }
  0x5b   : > { %v2188_v57 = vrot.slane %v605_v6, %v1612_v15  ;;  %v639_v20 = vcombine.high %v2056_v61, %v2056_v61  ;;  %v2203_v34 = vrot.slane %v2056_v61, %v1612_v15  ;;  %v656_v12 = vcombine.high %v2068_v28, %v2068_v28 }
  0x5c   : > { %v2199_v24 = vrot.slane %v622_v38, %v1612_v15  ;;  %v2216_v29 = vrot.slane %v2068_v28, %v1612_v15  ;;  %v738_v35 = vsel %vm737_vm3, %v2059_v43, -inf  ;;  %v745_v61 = vsel %vm737_vm3, %v416_v46, -inf }
  0x5d   : > { %v2212_v10 = vrot.slane %v639_v20, %v1612_v15  ;;  %v2229_v37 = vrot.slane %v656_v12, %v1612_v15  ;;  %v739_v28 = vrot.slane %v738_v35, 4  ;;  %v746_v36 = vrot.slane %v745_v61, 4 }
  0x5e   : > { %v752_v38 = vsel %vm737_vm3, %v2071_v17, -inf  ;;  %v759_v20 = vsel %vm737_vm3, %v417_v39, -inf  ;;  %v766_v43 = vsel %vm737_vm3, %v2062_v58, -inf  ;;  %v773_v6 = vsel %vm737_vm3, %v433_v18, -inf }
  0x5f   : > { %v740_v15 = vmax.f32 %v738_v35, %v739_v28  ;;  %v753_v12 = vrot.slane %v752_v38, 4  ;;  %v760_v27 = vrot.slane %v759_v20, 4  ;;  %v747_v26 = vmax.f32 %v745_v61, %v746_v36 }
  0x60   : > { %v767_v46 = vrot.slane %v766_v43, 4  ;;  %v780_v42 = vsel %vm737_vm3, %v2079_v41, -inf  ;;  %v774_v39 = vrot.slane %v773_v6, 4  ;;  %v787_v36 = vsel %vm737_vm3, %v434_v51, -inf }
  0x61   : > { %v741_v48 = vrot.slane %v740_v15, 2  ;;  %v754_v17 = vmax.f32 %v752_v38, %v753_v12  ;;  %v761_v16 = vmax.f32 %v759_v20, %v760_v27  ;;  %v748_v35 = vrot.slane %v747_v26, 2 }
  0x62   : > { %v768_v28 = vmax.f32 %v766_v43, %v767_v46  ;;  %v781_v11 = vrot.slane %v780_v42, 4  ;;  %v775_v14 = vmax.f32 %v773_v6, %v774_v39  ;;  %v788_v53 = vrot.slane %v787_v36, 4 }
  0x63   : > { %v742_v61 = vmax.f32 %v740_v15, %v741_v48  ;;  %v755_v5 = vrot.slane %v754_v17, 2  ;;  %v762_v58 = vrot.slane %v761_v16, 2  ;;  %v749_v18 = vmax.f32 %v747_v26, %v748_v35 }
  0x64   : > { %v769_v54 = vrot.slane %v768_v28, 2  ;;  %v782_v2 = vmax.f32 %v780_v42, %v781_v11  ;;  %v776_v20 = vrot.slane %v775_v14, 2  ;;  %v789_v8 = vmax.f32 %v787_v36, %v788_v53 }
  0x65   : > { %v743_v56 = vrot.slane %v742_v61, 1  ;;  %v756_v38 = vmax.f32 %v754_v17, %v755_v5  ;;  %v763_v27 = vmax.f32 %v761_v16, %v762_v58  ;;  %v750_v12 = vrot.slane %v749_v18, 1 }
  0x66   : > { %v770_v43 = vmax.f32 %v768_v28, %v769_v54  ;;  %v783_v46 = vrot.slane %v782_v2, 2  ;;  %v777_v15 = vmax.f32 %v775_v14, %v776_v20  ;;  %v790_v11 = vrot.slane %v789_v8, 2 }
  0x67   : > { %v757_v51 = vrot.slane %v756_v38, 1  ;;  %v764_v48 = vrot.slane %v763_v27, 1  ;;  %v2257_v60 = vmax.f32 %v742_v61, %v743_v56  ;;  %v2259_v42 = vmax.f32 %v749_v18, %v750_v12 }
  0x68   : > { %v771_v26 = vrot.slane %v770_v43, 1  ;;  %v784_v6 = vmax.f32 %v782_v2, %v783_v46  ;;  %v778_v16 = vrot.slane %v777_v15, 1  ;;  %v794_v54 = vsel %vm737_vm3, %v2065_v0, -inf }
  0x69   : > { %v2261_v5 = vmax.f32 %v756_v38, %v757_v51  ;;  %v2265_v53 = vmax.f32 %v763_v27, %v764_v48  ;;  %v791_v39 = vmax.f32 %v789_v8, %v790_v11  ;;  %v795_v35 = vrot.slane %v794_v54, 4 }
  0x6a   : > { %v785_v17 = vrot.slane %v784_v6, 1  ;;  %v2267_v28 = vmax.f32 %v770_v43, %v771_v26  ;;  %v801_v56 = vsel %vm737_vm3, %v450_v4, -inf  ;;  %v808_v2 = vsel %vm737_vm3, %v2084_v19, -inf }
  0x6b   : > { %v815_v14 = vsel %vm737_vm3, %v451_v63, -inf  ;;  %v2279_v36 = vmax.f32 %v777_v15, %v778_v16  ;;  %v796_v8 = vmax.f32 %v794_v54, %v795_v35  ;;  %v802_v58 = vrot.slane %v801_v56, 4 }
  0x6c   : > { %v2281_v61 = vmax.f32 %v784_v6, %v785_v17  ;;  %v809_v18 = vrot.slane %v808_v2, 4  ;;  %v816_v38 = vrot.slane %v815_v14, 4  ;;  %v822_v0 = vsel %vm737_vm3, %v2074_v33, -inf }
  0x6d   : > { %v829_v4 = vsel %vm737_vm3, %v467_v30, -inf  ;;  %v792_v27 = vrot.slane %v791_v39, 1  ;;  %v797_v19 = vrot.slane %v796_v8, 2  ;;  %v803_v20 = vmax.f32 %v801_v56, %v802_v58 }
  0x6e   : > { %v823_v63 = vrot.slane %v822_v0, 4  ;;  %v810_v12 = vmax.f32 %v808_v2, %v809_v18  ;;  %v817_v43 = vmax.f32 %v815_v14, %v816_v38  ;;  %v830_v46 = vrot.slane %v829_v4, 4 }
  0x6f   : > { %v836_v51 = vsel %vm737_vm3, %v2091_v40, -inf  ;;  %v798_v48 = vmax.f32 %v796_v8, %v797_v19  ;;  %v804_v15 = vrot.slane %v803_v20, 2  ;;  %v843_v33 = vsel %vm737_vm3, %v468_v59, -inf }
  0x70   : > { %v824_v26 = vmax.f32 %v822_v0, %v823_v63  ;;  %v837_v6 = vrot.slane %v836_v51, 4  ;;  %v811_v11 = vrot.slane %v810_v12, 2  ;;  %v818_v16 = vrot.slane %v817_v43, 2 }
  0x71   : > { %v831_v54 = vmax.f32 %v829_v4, %v830_v46  ;;  %v799_v30 = vrot.slane %v798_v48, 1  ;;  %v805_v17 = vmax.f32 %v803_v20, %v804_v15  ;;  %v844_v18 = vrot.slane %v843_v33, 4 }
  0x72   : > { %v825_v35 = vrot.slane %v824_v26, 2  ;;  %v838_v56 = vmax.f32 %v836_v51, %v837_v6  ;;  %v812_v2 = vmax.f32 %v810_v12, %v811_v11  ;;  %v819_v14 = vmax.f32 %v817_v43, %v818_v16 }
  0x73   : > { %v832_v58 = vrot.slane %v831_v54, 2  ;;  %v2295_v8 = vmax.f32 %v791_v39, %v792_v27  ;;  %v806_v38 = vrot.slane %v805_v17, 1  ;;  %v845_v41 = vmax.f32 %v843_v33, %v844_v18 }
  0x74   : > { %v826_v0 = vmax.f32 %v824_v26, %v825_v35  ;;  %v839_v19 = vrot.slane %v838_v56, 2  ;;  %v813_v63 = vrot.slane %v812_v2, 1  ;;  %v820_v4 = vrot.slane %v819_v14, 1 }
  0x75   : > { %v833_v46 = vmax.f32 %v831_v54, %v832_v58  ;;  %v2297_v40 = vmax.f32 %v798_v48, %v799_v30  ;;  %v850_v20 = vsel %vm737_vm3, %v2098_v7, -inf  ;;  %v2301_v12 = vmax.f32 %v805_v17, %v806_v38 }
  0x76   : > { %v827_v59 = vrot.slane %v826_v0, 1  ;;  %v840_v21 = vmax.f32 %v838_v56, %v839_v19  ;;  %v2303_v43 = vmax.f32 %v812_v2, %v813_v63  ;;  %v846_v27 = vrot.slane %v845_v41, 2 }
  0x77   : > { %v834_v39 = vrot.slane %v833_v46, 1  ;;  %v2305_v51 = vmax.f32 %v819_v14, %v820_v4  ;;  %v851_v26 = vrot.slane %v850_v20, 4  ;;  %v2762_v6 = vcombine.high %v2098_v7, %v2098_v7 }
  0x78   : > { %v841_v15 = vrot.slane %v840_v21, 1  ;;  %v2311_v11 = vmax.f32 %v826_v0, %v827_v59  ;;  %v847_v16 = vmax.f32 %v845_v41, %v846_v27  ;;  %v864_v33 = vsel %vm737_vm3, %v2103_v23, -inf }
  0x79   : > { %v857_v48 = vsel %vm737_vm3, %v2762_v6, -inf  ;;  %v2315_v30 = vmax.f32 %v833_v46, %v834_v39  ;;  %v852_v17 = vmax.f32 %v850_v20, %v851_v26  ;;  %v865_v35 = vrot.slane %v864_v33, 4 }
  0x7a   : > { %v858_v54 = vrot.slane %v857_v48, 4  ;;  %v2763_v56 = vcombine.high %v2103_v23, %v2103_v23  ;;  %v2321_v14 = vmax.f32 %v840_v21, %v841_v15  ;;  %v878_v41 = vsel %vm737_vm3, %v2106_v52, -inf }
  0x7b   : > { %v853_v18 = vrot.slane %v852_v17, 2  ;;  %v866_v38 = vmax.f32 %v864_v33, %v865_v35  ;;  %v879_v0 = vrot.slane %v878_v41, 4  ;;  %v2765_v19 = vcombine.high %v2106_v52, %v2106_v52 }
  0x7c   : > { %v871_v2 = vsel %vm737_vm3, %v2763_v56, -inf  ;;  %2764 = vst [vmem:[#allocation5_spill] sm:$0xff] %v2321_v14  ;;  %v859_v7 = vmax.f32 %v857_v48, %v858_v54  ;;  %v848_v4 = vrot.slane %v847_v16, 1  ;;  %v892_v27 = vsel %vm737_vm3, %v2111_v32, -inf }
  0x7d   : > { %v872_v58 = vrot.slane %v871_v2, 4  ;;  %v885_v63 = vsel %vm737_vm3, %v2765_v19, -inf  ;;  %v854_v20 = vmax.f32 %v852_v17, %v853_v18  ;;  %v867_v21 = vrot.slane %v866_v38, 2 }
  0x7e   : > { %v860_v46 = vrot.slane %v859_v7, 2  ;;  %v886_v59 = vrot.slane %v885_v63, 4  ;;  %v880_v39 = vmax.f32 %v878_v41, %v879_v0  ;;  %v893_v48 = vrot.slane %v892_v27, 4 }
  0x7f   : > { %v873_v23 = vmax.f32 %v871_v2, %v872_v58  ;;  %v855_v54 = vrot.slane %v854_v20, 1  ;;  %v868_v33 = vmax.f32 %v866_v38, %v867_v21  ;;  %v2766_v52 = vcombine.high %v2111_v32, %v2111_v32 }
  0x80   : > { %v861_v15 = vmax.f32 %v859_v7, %v860_v46  ;;  %v887_v6 = vmax.f32 %v885_v63, %v886_v59  ;;  %v881_v35 = vrot.slane %v880_v39, 2  ;;  %v894_v18 = vmax.f32 %v892_v27, %v893_v48 }
  0x81   : > { %v874_v26 = vrot.slane %v873_v23, 2  ;;  %v899_v56 = vsel %vm737_vm3, %v2766_v52, -inf  ;;  %v2335_v41 = vmax.f32 %v847_v16, %v848_v4  ;;  %v869_v0 = vrot.slane %v868_v33, 1 }
  0x82   : > { %v862_v2 = vrot.slane %v861_v15, 1  ;;  %v888_v17 = vrot.slane %v887_v6, 2  ;;  %v882_v19 = vmax.f32 %v880_v39, %v881_v35  ;;  %v900_v7 = vrot.slane %v899_v56, 4 }
  0x83   : > { %v875_v58 = vmax.f32 %v873_v23, %v874_v26  ;;  %2767 = vst [vmem:[#allocation6_spill] sm:$0xff] %v2335_v41  ;;  %v2337_v46 = vmax.f32 %v854_v20, %v855_v54  ;;  %v895_v38 = vrot.slane %v894_v18, 2  ;;  %v906_v52 = vsel %vm737_vm3, %v2114_v31, -inf }
  0x84   : > { %v889_v59 = vmax.f32 %v887_v6, %v888_v17  ;;  %v2339_v21 = vmax.f32 %v861_v15, %v862_v2  ;;  %v883_v14 = vrot.slane %v882_v19, 1  ;;  %v901_v32 = vmax.f32 %v899_v56, %v900_v7 }
  0x85   : > { %v876_v63 = vrot.slane %v875_v58, 1  ;;  %v2343_v23 = vmax.f32 %v868_v33, %v869_v0  ;;  %v896_v16 = vmax.f32 %v894_v18, %v895_v38  ;;  %v907_v4 = vrot.slane %v906_v52, 4 }
  0x86   : > { %v890_v27 = vrot.slane %v889_v59, 1  ;;  %v902_v39 = vrot.slane %v901_v32, 2  ;;  %v2768_v20 = vcombine.high %v2114_v31, %v2114_v31  ;;  %v920_v15 = vsel %vm737_vm3, %v2121_v25, -inf }
  0x87   : > { %v2345_v26 = vmax.f32 %v875_v58, %v876_v63  ;;  %v2353_v48 = vmax.f32 %v882_v19, %v883_v14  ;;  %v897_v54 = vrot.slane %v896_v16, 1  ;;  %v908_v35 = vmax.f32 %v906_v52, %v907_v4 }
  0x88   : > { %v913_v6 = vsel %vm737_vm3, %v2768_v20, -inf  ;;  %v903_v56 = vmax.f32 %v901_v32, %v902_v39  ;;  %v921_v2 = vrot.slane %v920_v15, 4  ;;  %v2770_v58 = vcombine.high %v2121_v25, %v2121_v25 }
  0x89   : > { %2769 = vst [vmem:[#allocation7_spill] sm:$0xff] %v2353_v48  ;;  %v914_v33 = vrot.slane %v913_v6, 4  ;;  %v934_v31 = vsel %vm737_vm3, %v2124_v1, -inf  ;;  %v2361_v18 = vmax.f32 %v889_v59, %v890_v27  ;;  %v909_v0 = vrot.slane %v908_v35, 2 }
  0x8a   : > { %v927_v17 = vsel %vm737_vm3, %v2770_v58, -inf  ;;  %v904_v14 = vrot.slane %v903_v56, 1  ;;  %v922_v19 = vmax.f32 %v920_v15, %v921_v2  ;;  %v935_v38 = vrot.slane %v934_v31, 4 }
  0x8b   : > { %2771 = vst [vmem:[#allocation8_spill] sm:$0xff] %v2361_v18  ;;  %v915_v7 = vmax.f32 %v913_v6, %v914_v33  ;;  %v928_v63 = vrot.slane %v927_v17, 4  ;;  %v2772_v32 = vcombine.high %v2124_v1, %v2124_v1  ;;  %v910_v4 = vmax.f32 %v908_v35, %v909_v0 }
  0x8c   : > { %v2367_v58 = vmax.f32 %v896_v16, %v897_v54  ;;  %v923_v41 = vrot.slane %v922_v19, 2  ;;  %v936_v59 = vmax.f32 %v934_v31, %v935_v38  ;;  %v948_v27 = vsel %vm737_vm3, %v2131_v50, -inf }
  0x8d   : > { %v941_v52 = vsel %vm737_vm3, %v2772_v32, -inf  ;;  %v916_v25 = vrot.slane %v915_v7, 2  ;;  %v929_v39 = vmax.f32 %v927_v17, %v928_v63  ;;  %v911_v6 = vrot.slane %v910_v4, 1 }
  0x8e   : > { %v942_v20 = vrot.slane %v941_v52, 4  ;;  %2773 = vst [vmem:[#allocation9_spill] sm:$0xff] %v2367_v58  ;;  %v924_v18 = vmax.f32 %v922_v19, %v923_v41  ;;  %v937_v48 = vrot.slane %v936_v59, 2  ;;  %v949_v1 = vrot.slane %v948_v27, 4 }
  0x8f   : > { %v917_v33 = vmax.f32 %v915_v7, %v916_v25  ;;  %v930_v15 = vrot.slane %v929_v39, 2  ;;  %v2774_v35 = vcombine.high %v2131_v50, %v2131_v50  ;;  %v2375_v0 = vmax.f32 %v903_v56, %v904_v14 }
  0x90   : > { %v943_v2 = vmax.f32 %v941_v52, %v942_v20  ;;  %v925_v63 = vrot.slane %v924_v18, 1  ;;  %v938_v38 = vmax.f32 %v936_v59, %v937_v48  ;;  %v950_v32 = vmax.f32 %v948_v27, %v949_v1 }
  0x91   : > { %v955_v17 = vsel %vm737_vm3, %v2774_v35, -inf  ;;  %2775 = vst [vmem:[#allocation10_spill] sm:$0xff] %v2375_v0  ;;  %v918_v16 = vrot.slane %v917_v33, 1  ;;  %v931_v54 = vmax.f32 %v929_v39, %v930_v15  ;;  %v2377_v7 = vmax.f32 %v910_v4, %v911_v6 }
  0x92   : > { %v944_v31 = vrot.slane %v943_v2, 2  ;;  %v956_v58 = vrot.slane %v955_v17, 4  ;;  %v962_v19 = vsel %vm737_vm3, %v2138_v9, -inf  ;;  %v939_v50 = vrot.slane %v938_v38, 1 }
  0x93   : > { %v932_v52 = vrot.slane %v931_v54, 1  ;;  %v2381_v25 = vmax.f32 %v917_v33, %v918_v16  ;;  %v951_v20 = vrot.slane %v950_v32, 2  ;;  %v2383_v14 = vmax.f32 %v924_v18, %v925_v63 }
  0x94   : > { %v945_v41 = vmax.f32 %v943_v2, %v944_v31  ;;  %v957_v56 = vmax.f32 %v955_v17, %v956_v58  ;;  %v963_v15 = vrot.slane %v962_v19, 4  ;;  %v2777_v48 = vcombine.high %v2138_v9, %v2138_v9 }
  0x95   : > { %v2385_v39 = vmax.f32 %v931_v54, %v932_v52  ;;  %v952_v27 = vmax.f32 %v950_v32, %v951_v20  ;;  %v2391_v1 = vmax.f32 %v938_v38, %v939_v50  ;;  %v976_v58 = vsel %vm737_vm3, %v2143_v44, -inf }
  0x96   : > { %v969_v4 = vsel %vm737_vm3, %v2777_v48, -inf  ;;  %v946_v59 = vrot.slane %v945_v41, 1  ;;  %v958_v6 = vrot.slane %v957_v56, 2  ;;  %v964_v33 = vmax.f32 %v962_v19, %v963_v15 }
  0x97   : > { %2776 = vst [vmem:[#allocation11_spill] sm:$0xff] %v2385_v39  ;;  %v970_v2 = vrot.slane %v969_v4, 4  ;;  %2778 = vst [vmem:[#allocation12_spill] sm:$0xff] %v2391_v1  ;;  %v2779_v18 = vcombine.high %v2143_v44, %v2143_v44  ;;  %v953_v17 = vrot.slane %v952_v27, 1  ;;  %v977_v54 = vrot.slane %v976_v58, 4 }
  0x98   : > { %v959_v16 = vmax.f32 %v957_v56, %v958_v6  ;;  %v965_v31 = vrot.slane %v964_v33, 2  ;;  %v990_v32 = vsel %vm737_vm3, %v2146_v3, -inf  ;;  %v2780_v38 = vcombine.high %v2146_v3, %v2146_v3 }
  0x99   : > { %v983_v35 = vsel %vm737_vm3, %v2779_v18, -inf  ;;  %v971_v9 = vmax.f32 %v969_v4, %v970_v2  ;;  %v2405_v19 = vmax.f32 %v945_v41, %v946_v59  ;;  %v978_v20 = vmax.f32 %v976_v58, %v977_v54 }
  0x9a   : > { %v984_v63 = vrot.slane %v983_v35, 4  ;;  %v997_v52 = vsel %vm737_vm3, %v2780_v38, -inf  ;;  %v960_v50 = vrot.slane %v959_v16, 1  ;;  %v966_v15 = vmax.f32 %v964_v33, %v965_v31 }
  0x9b   : > { %2781 = vst [vmem:[#allocation13_spill] sm:$0xff] %v2405_v19  ;;  %v972_v44 = vrot.slane %v971_v9, 2  ;;  %v991_v56 = vrot.slane %v990_v32, 4  ;;  %v998_v4 = vrot.slane %v997_v52, 4  ;;  %v2407_v6 = vmax.f32 %v952_v27, %v953_v17 }
  0x9c   : > { %v985_v48 = vmax.f32 %v983_v35, %v984_v63  ;;  %v979_v18 = vrot.slane %v978_v20, 2  ;;  %v1004_v0 = vsel %vm737_vm3, %v2151_v22, -inf  ;;  %v967_v1 = vrot.slane %v966_v15, 1 }
  0x9d   : > { %2782 = vst [vmem:[#allocation14_spill] sm:$0xff] %v2407_v6  ;;  %v973_v2 = vmax.f32 %v971_v9, %v972_v44  ;;  %v992_v39 = vmax.f32 %v990_v32, %v991_v56  ;;  %v999_v38 = vmax.f32 %v997_v52, %v998_v4  ;;  %v1005_v19 = vrot.slane %v1004_v0, 4 }
  0x9e   : > { %v986_v3 = vrot.slane %v985_v48, 2  ;;  %v980_v59 = vmax.f32 %v978_v20, %v979_v18  ;;  %v2783_v33 = vcombine.high %v2151_v22, %v2151_v22  ;;  %v2415_v35 = vmax.f32 %v959_v16, %v960_v50 }
  0x9f   : > { %v974_v41 = vrot.slane %v973_v2, 1  ;;  %v993_v17 = vrot.slane %v992_v39, 2  ;;  %v1000_v9 = vrot.slane %v999_v38, 2  ;;  %v2417_v54 = vmax.f32 %v966_v15, %v967_v1 }
  0xa0   : > { %v1011_v58 = vsel %vm737_vm3, %v2783_v33, -inf  ;;  %2784 = vst [vmem:[#allocation15_spill] sm:$0xff] %v2415_v35  ;;  %v987_v27 = vmax.f32 %v985_v48, %v986_v3  ;;  %v981_v31 = vrot.slane %v980_v59, 1  ;;  %v1006_v63 = vmax.f32 %v1004_v0, %v1005_v19 }
  0xa1   : > { %v1012_v44 = vrot.slane %v1011_v58, 4  ;;  %v994_v52 = vmax.f32 %v992_v39, %v993_v17  ;;  %v1001_v56 = vmax.f32 %v999_v38, %v1000_v9  ;;  %v1018_v20 = vsel %vm737_vm3, %v2154_v13, -inf }
  0xa2   : > { %v988_v32 = vrot.slane %v987_v27, 1  ;;  %v2421_v4 = vmax.f32 %v973_v2, %v974_v41  ;;  %v1007_v22 = vrot.slane %v1006_v63, 2  ;;  %v1019_v16 = vrot.slane %v1018_v20, 4 }
  0xa3   : > { %v1013_v18 = vmax.f32 %v1011_v58, %v1012_v44  ;;  %v2423_v50 = vmax.f32 %v980_v59, %v981_v31  ;;  %v995_v48 = vrot.slane %v994_v52, 1  ;;  %v1002_v3 = vrot.slane %v1001_v56, 1 }
  0xa4   : > { %v2785_v1 = vcombine.high %v2154_v13, %v2154_v13  ;;  %v1008_v19 = vmax.f32 %v1006_v63, %v1007_v22  ;;  %v1020_v15 = vmax.f32 %v1018_v20, %v1019_v16  ;;  %v2429_v33 = vmax.f32 %v987_v27, %v988_v32 }
  0xa5   : > { %v1014_v39 = vrot.slane %v1013_v18, 2  ;;  %v2431_v2 = vmax.f32 %v994_v52, %v995_v48  ;;  %v1032_v41 = vsel %vm737_vm3, %v2161_v45, -inf  ;;  %v2787_v59 = vcombine.high %v2161_v45, %v2161_v45 }
  0xa6   : > { %v1025_v0 = vsel %vm737_vm3, %v2785_v1, -inf  ;;  %v1009_v17 = vrot.slane %v1008_v19, 1  ;;  %v1021_v9 = vrot.slane %v1020_v15, 2  ;;  %v1033_v63 = vrot.slane %v1032_v41, 4 }
  0xa7   : > { %v1026_v38 = vrot.slane %v1025_v0, 4  ;;  %2786 = vst [vmem:[#allocation16_spill] sm:$0xff] %v2431_v2  ;;  %v1039_v58 = vsel %vm737_vm3, %v2787_v59, -inf  ;;  %v1015_v13 = vmax.f32 %v1013_v18, %v1014_v39  ;;  %v1046_v27 = vsel %vm737_vm3, %v2164_v55, -inf }
  0xa8   : > { %v1040_v44 = vrot.slane %v1039_v58, 4  ;;  %v2788_v32 = vcombine.high %v2164_v55, %v2164_v55  ;;  %v2445_v20 = vmax.f32 %v1001_v56, %v1002_v3  ;;  %v1022_v45 = vmax.f32 %v1020_v15, %v1021_v9 }
  0xa9   : > { %v1027_v31 = vmax.f32 %v1025_v0, %v1026_v38  ;;  %v1016_v22 = vrot.slane %v1015_v13, 1  ;;  %v1034_v48 = vmax.f32 %v1032_v41, %v1033_v63  ;;  %v1047_v18 = vrot.slane %v1046_v27, 4 }
  0xaa   : > { %v1053_v52 = vsel %vm737_vm3, %v2788_v32, -inf  ;;  %v1041_v1 = vmax.f32 %v1039_v58, %v1040_v44  ;;  %v2447_v0 = vmax.f32 %v1008_v19, %v1009_v17  ;;  %v1023_v38 = vrot.slane %v1022_v45, 1 }
  0xab   : > { %v1028_v16 = vrot.slane %v1027_v31, 2  ;;  %v1054_v39 = vrot.slane %v1053_v52, 4  ;;  %v1060_v35 = vsel %vm737_vm3, %v2171_v49, -inf  ;;  %v1035_v2 = vrot.slane %v1034_v48, 2 }
  0xac   : > { %2789 = vst [vmem:[#allocation17_spill] sm:$0xff] %v2447_v0  ;;  %v1042_v55 = vrot.slane %v1041_v1, 2  ;;  %v1048_v6 = vmax.f32 %v1046_v27, %v1047_v18  ;;  %v2451_v56 = vmax.f32 %v1015_v13, %v1016_v22  ;;  %v1061_v15 = vrot.slane %v1060_v35, 4 }
  0xad   : > { %v1029_v59 = vmax.f32 %v1027_v31, %v1028_v16  ;;  %v1055_v32 = vmax.f32 %v1053_v52, %v1054_v39  ;;  %v2791_v41 = vcombine.high %v2171_v49, %v2171_v49  ;;  %v1036_v19 = vmax.f32 %v1034_v48, %v1035_v2 }
  0xae   : > { %2790 = vst [vmem:[#allocation18_spill] sm:$0xff] %v2451_v56  ;;  %v1043_v17 = vmax.f32 %v1041_v1, %v1042_v55  ;;  %v1049_v9 = vrot.slane %v1048_v6, 2  ;;  %v2457_v63 = vmax.f32 %v1022_v45, %v1023_v38  ;;  %v1062_v44 = vmax.f32 %v1060_v35, %v1061_v15 }
  0xaf   : > { %v1030_v3 = vrot.slane %v1029_v59, 1  ;;  %v1067_v58 = vsel %vm737_vm3, %v2791_v41, -inf  ;;  %v1056_v31 = vrot.slane %v1055_v32, 2  ;;  %v1074_v27 = vsel %vm737_vm3, %v2181_v47, -inf }
  0xb0   : > { %v1068_v16 = vrot.slane %v1067_v58, 4  ;;  %v1037_v13 = vrot.slane %v1036_v19, 1  ;;  %v1044_v52 = vrot.slane %v1043_v17, 1  ;;  %v1050_v22 = vmax.f32 %v1048_v6, %v1049_v9 }
  0xb1   : > { %v1057_v18 = vmax.f32 %v1055_v32, %v1056_v31  ;;  %v1063_v39 = vrot.slane %v1062_v44, 2  ;;  %v1075_v49 = vrot.slane %v1074_v27, 4  ;;  %v2792_v2 = vcombine.high %v2181_v47, %v2181_v47 }
  0xb2   : > { %v1069_v56 = vmax.f32 %v1067_v58, %v1068_v16  ;;  %v2465_v1 = vmax.f32 %v1029_v59, %v1030_v3  ;;  %v2467_v45 = vmax.f32 %v1036_v19, %v1037_v13  ;;  %v1051_v35 = vrot.slane %v1050_v22, 1 }
  0xb3   : > { %v1081_v48 = vsel %vm737_vm3, %v2792_v2, -inf  ;;  %v1058_v38 = vrot.slane %v1057_v18, 1  ;;  %v1064_v55 = vmax.f32 %v1062_v44, %v1063_v39  ;;  %v1076_v41 = vmax.f32 %v1074_v27, %v1075_v49 }
  0xb4   : > { %v1070_v15 = vrot.slane %v1069_v56, 2  ;;  %v1082_v0 = vrot.slane %v1081_v48, 4  ;;  %v2469_v6 = vmax.f32 %v1043_v17, %v1044_v52  ;;  %v2471_v32 = vmax.f32 %v1050_v22, %v1051_v35 }
  0xb5   : > { %v1088_v58 = vsel %vm737_vm3, %v2188_v57, -inf  ;;  %v2795_v47 = vcombine.high %v2188_v57, %v2188_v57  ;;  %v1065_v3 = vrot.slane %v1064_v55, 1  ;;  %v1077_v9 = vrot.slane %v1076_v41, 2 }
  0xb6   : > { %2793 = vst [vmem:[#allocation19_spill] sm:$0xff] %v2469_v6  ;;  %2794 = vst [vmem:[#allocation20_spill] sm:$0xff] %v2471_v32  ;;  %v1071_v19 = vmax.f32 %v1069_v56, %v1070_v15  ;;  %v1083_v31 = vmax.f32 %v1081_v48, %v1082_v0  ;;  %v1089_v44 = vrot.slane %v1088_v58, 4  ;;  %v1102_v17 = vsel %vm737_vm3, %v2192_v62, -inf }
  0xb7   : > { %v1095_v59 = vsel %vm737_vm3, %v2795_v47, -inf  ;;  %v2796_v27 = vcombine.high %v2192_v62, %v2192_v62  ;;  %v2485_v52 = vmax.f32 %v1057_v18, %v1058_v38  ;;  %v1078_v57 = vmax.f32 %v1076_v41, %v1077_v9 }
  0xb8   : > { %v1096_v16 = vrot.slane %v1095_v59, 4  ;;  %v1072_v22 = vrot.slane %v1071_v19, 1  ;;  %v1084_v39 = vrot.slane %v1083_v31, 2  ;;  %v1090_v49 = vmax.f32 %v1088_v58, %v1089_v44 }
  0xb9   : > { %v1109_v13 = vsel %vm737_vm3, %v2796_v27, -inf  ;;  %v1103_v56 = vrot.slane %v1102_v17, 4  ;;  %v2487_v0 = vmax.f32 %v1064_v55, %v1065_v3  ;;  %v1079_v48 = vrot.slane %v1078_v57, 1 }
  0xba   : > { %v1097_v2 = vmax.f32 %v1095_v59, %v1096_v16  ;;  %v1110_v35 = vrot.slane %v1109_v13, 4  ;;  %v1085_v15 = vmax.f32 %v1083_v31, %v1084_v39  ;;  %v1116_v47 = vsel %vm737_vm3, %v2199_v24, -inf }
  0xbb   : > { %2797 = vst [vmem:[#allocation21_spill] sm:$0xff] %v2487_v0  ;;  %v1091_v32 = vrot.slane %v1090_v49, 2  ;;  %v1104_v6 = vmax.f32 %v1102_v17, %v1103_v56  ;;  %v2491_v18 = vmax.f32 %v1071_v19, %v1072_v22  ;;  %v1117_v41 = vrot.slane %v1116_v47, 4 }
  0xbc   : > { %v1098_v62 = vrot.slane %v1097_v2, 2  ;;  %v1111_v27 = vmax.f32 %v1109_v13, %v1110_v35  ;;  %v1086_v38 = vrot.slane %v1085_v15, 1  ;;  %v2799_v58 = vcombine.high %v2199_v24, %v2199_v24 }
  0xbd   : > { %2798 = vst [vmem:[#allocation22_spill] sm:$0xff] %v2491_v18  ;;  %v1092_v55 = vmax.f32 %v1090_v49, %v1091_v32  ;;  %v1105_v9 = vrot.slane %v1104_v6, 2  ;;  %v2497_v44 = vmax.f32 %v1078_v57, %v1079_v48  ;;  %v1118_v16 = vmax.f32 %v1116_v47, %v1117_v41 }
  0xbe   : > { %v1123_v59 = vsel %vm737_vm3, %v2799_v58, -inf  ;;  %v1099_v3 = vmax.f32 %v1097_v2, %v1098_v62  ;;  %v1112_v31 = vrot.slane %v1111_v27, 2  ;;  %v1130_v17 = vsel %vm737_vm3, %v2203_v34, -inf }
  0xbf   : > { %v1124_v39 = vrot.slane %v1123_v59, 4  ;;  %v1093_v19 = vrot.slane %v1092_v55, 1  ;;  %v1106_v22 = vmax.f32 %v1104_v6, %v1105_v9  ;;  %v1119_v35 = vrot.slane %v1118_v16, 2 }
  0xc0   : > { %v1100_v13 = vrot.slane %v1099_v3, 1  ;;  %v1113_v56 = vmax.f32 %v1111_v27, %v1112_v31  ;;  %v1131_v24 = vrot.slane %v1130_v17, 4  ;;  %v2800_v32 = vcombine.high %v2203_v34, %v2203_v34 }
  0xc1   : > { %v1125_v18 = vmax.f32 %v1123_v59, %v1124_v39  ;;  %v2505_v2 = vmax.f32 %v1085_v15, %v1086_v38  ;;  %v2507_v57 = vmax.f32 %v1092_v55, %v1093_v19  ;;  %v1107_v48 = vrot.slane %v1106_v22, 1 }
  0xc2   : > { %v1137_v49 = vsel %vm737_vm3, %v2800_v32, -inf  ;;  %v1114_v47 = vrot.slane %v1113_v56, 1  ;;  %v1120_v62 = vmax.f32 %v1118_v16, %v1119_v35  ;;  %v1132_v58 = vmax.f32 %v1130_v17, %v1131_v24 }
  0xc3   : > { %v1126_v41 = vrot.slane %v1125_v18, 2  ;;  %v1138_v0 = vrot.slane %v1137_v49, 4  ;;  %v2509_v6 = vmax.f32 %v1099_v3, %v1100_v13  ;;  %v2511_v27 = vmax.f32 %v1106_v22, %v1107_v48 }
  0xc4   : > { %v1144_v59 = vsel %vm737_vm3, %v2212_v10, -inf  ;;  %v2802_v34 = vcombine.high %v2212_v10, %v2212_v10  ;;  %v1121_v38 = vrot.slane %v1120_v62, 1  ;;  %v1133_v9 = vrot.slane %v1132_v58, 2 }
  0xc5   : > { %2801 = vst [vmem:[#allocation23_spill] sm:$0xff] %v2511_v27  ;;  %v1127_v55 = vmax.f32 %v1125_v18, %v1126_v41  ;;  %v1139_v31 = vmax.f32 %v1137_v49, %v1138_v0  ;;  %v1145_v16 = vrot.slane %v1144_v59, 4  ;;  %v1158_v3 = vsel %vm737_vm3, %v2216_v29, -inf }
  0xc6   : > { %v1151_v15 = vsel %vm737_vm3, %v2802_v34, -inf  ;;  %v2803_v17 = vcombine.high %v2216_v29, %v2216_v29  ;;  %v2525_v13 = vmax.f32 %v1113_v56, %v1114_v47  ;;  %v1134_v10 = vmax.f32 %v1132_v58, %v1133_v9 }
  0xc7   : > { %v1152_v39 = vrot.slane %v1151_v15, 4  ;;  %v1128_v22 = vrot.slane %v1127_v55, 1  ;;  %v1140_v35 = vrot.slane %v1139_v31, 2  ;;  %v1146_v24 = vmax.f32 %v1144_v59, %v1145_v16 }
  0xc8   : > { %v1165_v19 = vsel %vm737_vm3, %v2803_v17, -inf  ;;  %v1159_v18 = vrot.slane %v1158_v3, 4  ;;  %v2527_v0 = vmax.f32 %v1120_v62, %v1121_v38  ;;  %v1135_v49 = vrot.slane %v1134_v10, 1 }
  0xc9   : > { %v1153_v32 = vmax.f32 %v1151_v15, %v1152_v39  ;;  %v1166_v48 = vrot.slane %v1165_v19, 4  ;;  %v1141_v41 = vmax.f32 %v1139_v31, %v1140_v35  ;;  %v1172_v34 = vsel %vm737_vm3, %v2229_v37, -inf }
  0xca   : > { %2804 = vst [vmem:[#allocation24_spill] sm:$0xff] %v2527_v0  ;;  %v1147_v27 = vrot.slane %v1146_v24, 2  ;;  %v1160_v17 = vmax.f32 %v1158_v3, %v1159_v18  ;;  %v2531_v47 = vmax.f32 %v1127_v55, %v1128_v22  ;;  %v1173_v9 = vrot.slane %v1172_v34, 4 }
  0xcb   : > { %v1154_v29 = vrot.slane %v1153_v32, 2  ;;  %v1167_v56 = vmax.f32 %v1165_v19, %v1166_v48  ;;  %v1142_v58 = vrot.slane %v1141_v41, 1  ;;  %v2805_v59 = vcombine.high %v2229_v37, %v2229_v37 }
  0xcc   : > { %v1148_v15 = vmax.f32 %v1146_v24, %v1147_v27  ;;  %v1161_v31 = vrot.slane %v1160_v17, 2  ;;  %v2537_v39 = vmax.f32 %v1134_v10, %v1135_v49  ;;  %v1174_v35 = vmax.f32 %v1172_v34, %v1173_v9 }
  0xcd   : > { %v1179_v62 = vsel %vm737_vm3, %v2805_v59, -inf  ;;  %v1155_v38 = vmax.f32 %v1153_v32, %v1154_v29  ;;  %v1168_v16 = vrot.slane %v1167_v56, 2  ;;  %v1251_v37 = vsel %vm1250_vm4, %v2259_v42, %v2257_v60 }
  0xce   : > { %v1180_v0 = vrot.slane %v1179_v62, 4  ;;  %v1149_v55 = vrot.slane %v1148_v15, 1  ;;  %v1162_v19 = vmax.f32 %v1160_v17, %v1161_v31  ;;  %v1175_v18 = vrot.slane %v1174_v35, 2  ;;  %v2809_v31 = vld [vmem:[#allocation12_spill] sm:$0xff] }
  0xcf   : > { %v1156_v3 = vrot.slane %v1155_v38, 1  ;;  %v1169_v22 = vmax.f32 %v1167_v56, %v1168_v16  ;;  %v1143_v27 = vmax.f32 %v1141_v41, %v1142_v58  ;;  %v1253_v29 = vsel %vm1252_vm5, %v2261_v5, %v1251_v37  ;;  %v2815_v37 = vld [vmem:[#allocation16_spill] sm:$0xff] }
  0xd0   : > { %v1181_v48 = vmax.f32 %v1179_v62, %v1180_v0  ;;  %v2543_v24 = vmax.f32 %v1148_v15, %v1149_v55  ;;  %v1163_v10 = vrot.slane %v1162_v19, 1  ;;  %v1176_v49 = vmax.f32 %v1174_v35, %v1175_v18  ;;  %v2811_v55 = vld [vmem:[#allocation8_spill] sm:$0xff] }
  0xd1   : > { %v1170_v32 = vrot.slane %v1169_v22, 1  ;;  %v2549_v17 = vmax.f32 %v1155_v38, %v1156_v3  ;;  %v1255_v60 = vsel %vm1254_vm6, %v2265_v53, %v1253_v29  ;;  %v1264_v5 = vsel %vm1250_vm4, %v2301_v12, %v2297_v40 }
  0xd2   : > { %v1182_v34 = vrot.slane %v1181_v48, 2  ;;  %v2551_v0 = vmax.f32 %v1162_v19, %v1163_v10  ;;  %v1177_v42 = vrot.slane %v1176_v49, 1  ;;  %v1257_v56 = vsel %vm1256_vm7, %v2267_v28, %v1255_v60  ;;  %v2812_v19 = vld [vmem:[#allocation13_spill] sm:$0xff] }
  0xd3   : > { %v1259_v58 = vsel %vm1258_vm8, %v2279_v36, %v1257_v56  ;;  %v1171_v9 = vmax.f32 %v1169_v22, %v1170_v32  ;;  %v1265_v62 = vsel %vm1252_vm5, %v2303_v43, %v1264_v5  ;;  %v1271_v15 = vsel %vm1250_vm4, %v2339_v21, %v2337_v46  ;;  %v2806_v21 = vld [vmem:[#allocation11_spill] sm:$0xff]  ;;  %v2813_v22 = vld [vmem:[#allocation9_spill] sm:$0xff] }
  0xd4   : > { %v1183_v41 = vmax.f32 %v1181_v48, %v1182_v34  ;;  %v1178_v59 = vmax.f32 %v1176_v49, %v1177_v42  ;;  %v1261_v53 = vsel %vm1260_vm9, %v2281_v61, %v1259_v58  ;;  %v1266_v36 = vsel %vm1254_vm6, %v2305_v51, %v1265_v62  ;;  %v2814_v48 = vld [vmem:[#allocation14_spill] sm:$0xff]  ;;  %v2817_v34 = vld [vmem:[#allocation15_spill] sm:$0xff]  ;;  %v2818_v56 = vld [vmem:[#allocation17_spill] sm:$0xff] }
  0xd5   : > { %v1263_v28 = vsel %vm1262_vm10, %v2295_v8, %v1261_v53  ;;  %v1278_v40 = vsel %vm1250_vm4, %v2381_v25, %v2377_v7  ;;  %v1267_v61 = vsel %vm1256_vm7, %v2311_v11, %v1266_v36  ;;  %v1272_v43 = vsel %vm1252_vm5, %v2343_v23, %v1271_v15  ;;  %v2807_v7 = vld [vmem:[#allocation5_spill] sm:$0xff]  ;;  %v2816_v49 = vld [vmem:[#allocation10_spill] sm:$0xff]  ;;  %v2821_v62 = vld [vmem:[#allocation20_spill] sm:$0xff] }
  0xd6   : > { %v1184_v12 = vrot.slane %v1183_v41, 1  ;;  %v1279_v8 = vsel %vm1252_vm5, %v2383_v14, %v1278_v40  ;;  %1321 = vst.msk [vmem:[%s2582_s25] sm:$0xff] %vm214_vm0, %v1263_v28  ;;  %v1268_v51 = vsel %vm1258_vm8, %v2315_v30, %v1267_v61  ;;  %v1273_v46 = vsel %vm1254_vm6, %v2345_v26, %v1272_v43  ;;  %v2808_v14 = vld [vmem:[#allocation7_spill] sm:$0xff]  ;;  %v2810_v26 = vld [vmem:[#allocation6_spill] sm:$0xff]  ;;  %v2825_v43 = vld [vmem:[#allocation24_spill] sm:$0xff] }
  0xd7   : > { %v1280_v11 = vsel %vm1254_vm6, %v2806_v21, %v1279_v8  ;;  %v1285_v23 = vsel %vm1250_vm4, %v2421_v4, %v2417_v54  ;;  %v1269_v25 = vsel %vm1260_vm9, %v2807_v7, %v1268_v51  ;;  %v1274_v38 = vsel %vm1256_vm7, %v2808_v14, %v1273_v46  ;;  %v2823_v40 = vld [vmem:[#allocation23_spill] sm:$0xff] }
  0xd8   : > { %v1281_v30 = vsel %vm1256_vm7, %v2809_v31, %v1280_v11  ;;  %v1286_v16 = vsel %vm1252_vm5, %v2423_v50, %v1285_v23  ;;  %v1270_v35 = vsel %vm1262_vm10, %v2810_v26, %v1269_v25  ;;  %v1275_v3 = vsel %vm1258_vm8, %v2811_v55, %v1274_v38 }
  0xd9   : > { %v1282_v54 = vsel %vm1258_vm8, %v2812_v19, %v1281_v30  ;;  %v1287_v4 = vsel %vm1254_vm6, %v2429_v33, %v1286_v16  ;;  %v1276_v18 = vsel %vm1260_vm9, %v2813_v22, %v1275_v3  ;;  %v1292_v32 = vsel %vm1250_vm4, %v2465_v1, %v2457_v63  ;;  %1322 = vst.msk [vmem:[%s2582_s25 + $0x8] sm:$0xff] %vm214_vm0, %v1270_v35  ;;  %v2819_v63 = vld [vmem:[#allocation19_spill] sm:$0xff] }
  0xda   : > { %v1283_v50 = vsel %vm1260_vm9, %v2814_v48, %v1282_v54  ;;  %v1288_v10 = vsel %vm1256_vm7, %v2815_v37, %v1287_v4  ;;  %v1277_v33 = vsel %vm1262_vm10, %v2816_v49, %v1276_v18  ;;  %v1293_v42 = vsel %vm1252_vm5, %v2467_v45, %v1292_v32 }
  0xdb   : > { %v1284_v29 = vsel %vm1262_vm10, %v2817_v34, %v1283_v50  ;;  %v1289_v60 = vsel %vm1258_vm8, %v2445_v20, %v1288_v10  ;;  %v1294_v1 = vsel %vm1254_vm6, %v2819_v63, %v1293_v42  ;;  %v1299_v5 = vsel %vm1250_vm4, %v2505_v2, %v2497_v44  ;;  %1323 = vst.msk [vmem:[%s2582_s25 + $0x10] sm:$0xff] %vm214_vm0, %v1277_v33  ;;  %v2820_v20 = vld [vmem:[#allocation18_spill] sm:$0xff] }
  0xdc   : > { %v1290_v58 = vsel %vm1260_vm9, %v2818_v56, %v1289_v60  ;;  %v1306_v53 = vsel %vm1250_vm4, %v1143_v27, %v2537_v39  ;;  %1324 = vst.msk [vmem:[%s2582_s25 + $0x18] sm:$0xff] %vm214_vm0, %v1284_v29  ;;  %v1295_v28 = vsel %vm1256_vm7, %v2821_v62, %v1294_v1  ;;  %v1300_v36 = vsel %vm1252_vm5, %v2507_v57, %v1299_v5  ;;  %v2822_v57 = vld [vmem:[#allocation21_spill] sm:$0xff] }
  0xdd   : > { %v1291_v45 = vsel %vm1262_vm10, %v2820_v20, %v1290_v58  ;;  %v1307_v15 = vsel %vm1252_vm5, %v2543_v24, %v1306_v53  ;;  %v1185_v44 = vmax.f32 %v1183_v41, %v1184_v12  ;;  %v1296_v2 = vsel %vm1258_vm8, %v2485_v52, %v1295_v28  ;;  %v2824_v12 = vld [vmem:[#allocation22_spill] sm:$0xff] }
  0xde   : > { %v1301_v39 = vsel %vm1254_vm6, %v2509_v6, %v1300_v36  ;;  %v1308_v27 = vsel %vm1254_vm6, %v2549_v17, %v1307_v15  ;;  %1325 = vst.msk [vmem:[%s2582_s25 + $0x20] sm:$0xff] %vm214_vm0, %v1291_v45  ;;  %v1297_v24 = vsel %vm1260_vm9, %v2822_v57, %v1296_v2 }
  0xdf   : > { %v1302_v41 = vsel %vm1256_vm7, %v2823_v40, %v1301_v39  ;;  %v1309_v52 = vsel %vm1256_vm7, %v2551_v0, %v1308_v27  ;;  %v1298_v6 = vsel %vm1262_vm10, %v2824_v12, %v1297_v24 }
  0xe0   : > { %v1303_v17 = vsel %vm1258_vm8, %v2525_v13, %v1302_v41  ;;  %v1310_v61 = vsel %vm1258_vm8, %v1171_v9, %v1309_v52  ;;  %1326 = vst.msk [vmem:[%s2582_s25 + $0x28] sm:$0xff] %vm214_vm0, %v1298_v6 }
  0xe1   : > { %v1304_v0 = vsel %vm1260_vm9, %v2825_v43, %v1303_v17  ;;  %v1311_v8 = vsel %vm1260_vm9, %v1178_v59, %v1310_v61 }
  0xe2   : > { %v1305_v13 = vsel %vm1262_vm10, %v2531_v47, %v1304_v0  ;;  %v1312_v9 = vsel %vm1262_vm10, %v1185_v44, %v1311_v8 }
  0xe3   : > { %1327 = vst.msk [vmem:[%s2582_s25 + $0x30] sm:$0xff] %vm214_vm0, %v1305_v13  ;;  %1328 = vst.msk [vmem:[%s2582_s25 + $0x38] sm:$0xff] %vm214_vm0, %v1312_v9 }
  0xe4   : > { %1473 = shalt.err (!%p1470_p3)
}
  0xe5   : > { %s1474_s11 = scalar_lea.hbm %s2675_s30, 1024  ;;  %s1478_s18 = scalar_lea.hbm %s2735_s1, 2048 }
  0xe6   : > { %p1475_p4 = scmp.ne.s32.totalorder %s2675_s30, %s1474_s11  ;;  %p1479_p9 = scmp.lt.u32.totalorder %s2675_s30, %s2735_s1 }
  0xe7   : > { %p1480_p10 = scmp.lt.u32.totalorder %s1478_s18, %s1474_s11  ;;  %p1482_p12 = scmp.lt.u32.totalorder %s1474_s11, %s2675_s30 }
  0xe8   : > { %p1476_p7 = pnand %p1475_p4, %p1576_p5 }
  0xe9   : > { %p1481_p11 = por %p1480_p10, %p1479_p9 }
  0xea   : > { %p1477_p8 = pneg %p1476_p7 }
  0xeb   : > { %p1483_p13 = por %p1482_p12, %p1481_p11 }
  0xed   : > { %p1484_p0 = pnand %p1483_p13, %p1477_p8 }
  0xef   : > { %1487 = shalt.err (!%p1484_p0)
}
  0xf0   : > { %s1526_s21 = smov 128   ;;  %s1527_s22 = smov 8  }
  0xf1   : > { %1418 = dma.vmem_to_hbm [thread:$0]  (%p1576_p5), %s2677_s27, 1024, %s2675_s30, %s2693_s2, %s1526_s21, %s1526_s21, %s1527_s22  }
  0xf2 PF: > { %p1424_p1 = scmp.ge.s32.totalorder %s1522_s9, 2  ;;  %s1358_s23 = sand.u32 1, %s1510_s6  }
  0xf3   : > { %s1359_s24 = scalar_lea.sflag [#allocation3], %s1358_s23 }
  0xf4   : > { %p1421_p2 = pnand %p1424_p1, %p1580_p6 }
  0xf6   : > { %1505 = dma.done.wait (!%p1421_p2), %s1359_s24, 1024  }
  0xf7   : > { %1507 = vsyncadd (!%p1421_p2), %s1359_s24, 4294966272  ;;  %p11_p3 = scmp.ge.s32.totalorder %s1563_s12, 4   ;;  %s2826_s6 = smov %s1514_s7 }
  0xf8   : > { %s2827_s7 = smov %s1518_s8  ;;  %s2828_s8 = smov %s1574_s15 }
  0xf9   : > { %s2829_s9 = smov %s1563_s12  ;;  %13 = sbr.rel (!%p11_p3) target bundleno = 3 (0x3), region = 59 }
 0x100   :  { %1364 = vsyncpa [#allocation3], 1 }
 0x101   :  { %1366 = vsyncpa [#allocation3 + $0x1], 1 }

</bundles_post_ra>
